<compile_context>
chip_gen: v6e
topology: v6e:2x2x1
jax: 0.10.0
libtpu: 0.0.40
codegen_flags: <defaults>
</compile_context>

<pallas_src>
import functools

import numpy as np
import jax
import jax.numpy as jnp
from jax import lax
from jax.experimental import pallas as pl
from jax.experimental.pallas import tpu as pltpu

_PAD = 8  # row-padding offset inside VMEM scratch (sublane-tile aligned)


# ----------------------------------------------------------------------------
# Weight packing (eager, once): fold the kx taps of every conv into
# block-banded matrices so that inside the kernel each conv layer is a plain
# matmul over lane-dense (rows, W*C) activation slabs.
# ----------------------------------------------------------------------------
def _band_regular(w_ky, width, pad):
    """w_ky: (Kx, Cin, Cout) -> (width*Cin, width*Cout);
    M[xi*Cin+ci, xo*Cout+co] = w_ky[kx, ci, co] with xi = xo + kx - pad."""
    kxs, ci, co = w_ky.shape
    m = np.zeros((width * ci, width * co), np.float32)
    for xo in range(width):
        for kx in range(kxs):
            xi = xo + kx - pad
            if 0 <= xi < width:
                m[xi * ci:(xi + 1) * ci, xo * co:(xo + 1) * co] += w_ky[kx]
    return m


def _band_transposed(w_ky, w_in, w_out, stride, pad):
    """w_ky: (Kx, Cin, Cout) -> (w_in*Cin, w_out*Cout);
    M[xi*Cin+ci, xo*Cout+co] = w_ky[kx, ci, co] with xo = stride*xi - pad + kx."""
    kxs, ci, co = w_ky.shape
    m = np.zeros((w_in * ci, w_out * co), np.float32)
    for xi in range(w_in):
        for kx in range(kxs):
            xo = stride * xi - pad + kx
            if 0 <= xo < w_out:
                m[xi * ci:(xi + 1) * ci, xo * co:(xo + 1) * co] += w_ky[kx]
    return m


def pack_decoder_params(params, height, width):
    """Precompute banded weight matrices + width-tiled biases (runs eagerly)."""
    del height
    p = {k: np.asarray(v, np.float32) for k, v in params.items()}
    w2, w3 = 2 * width, 4 * width

    def reg(w_oihw, wd, pad):     # Conv2d weight (Cout, Cin, Ky, Kx)
        return np.stack(
            [_band_regular(np.transpose(w_oihw[:, :, ky, :], (2, 1, 0)), wd, pad)
             for ky in range(w_oihw.shape[2])], axis=0)

    def tr(w_iohw, w_in, w_out):  # ConvTranspose2d weight (Cin, Cout, Ky, Kx)
        return np.stack(
            [_band_transposed(np.transpose(w_iohw[:, :, ky, :], (2, 0, 1)),
                              w_in, w_out, 2, 1)
             for ky in range(w_iohw.shape[2])], axis=0)

    packed = {
        "r1m3": reg(p["res1_w3"], width, 1),
        "r1b3": np.tile(p["res1_b3"], width)[None, :],
        "r1m1": reg(p["res1_w1"], width, 0)[0],
        "r1b1": np.tile(p["res1_b1"], width)[None, :],
        "r2m3": reg(p["res2_w3"], width, 1),
        "r2b3": np.tile(p["res2_b3"], width)[None, :],
        "r2m1": reg(p["res2_w1"], width, 0)[0],
        "r2b1": np.tile(p["res2_b1"], width)[None, :],
        "c1m": tr(p["ct1_w"], width, w2),
        "c1b": np.tile(p["ct1_b"], w2)[None, :],
        "c2m": tr(p["ct2_w"], w2, w3),
        "c2b": np.tile(p["ct2_b"], w3)[None, :],
    }
    return {k: jnp.asarray(v) for k, v in packed.items()}


# ----------------------------------------------------------------------------
# The fused decoder kernel (one grid step = one image).
# Activation layout everywhere: (row, x*C + c), i.e. width folded onto lanes.
# ----------------------------------------------------------------------------
def _decoder_kernel(H,
                    x_ref, r1m3, r1b3, r1m1, r1b1, r2m3, r2b3, r2m1, r2b1,
                    c1m, c1b, c2m, c2b, o_ref, xa, p0, p1):
    f32 = jnp.float32
    dot = functools.partial(jnp.dot, preferred_element_type=f32)

    # Residual-stage activation in a row-padded scratch (data rows _PAD.._PAD+H-1).
    xa[...] = jnp.zeros_like(xa)
    xa[_PAD:_PAD + H, :] = x_ref[0].astype(f32)

    def residual(m3, b3, m1, b1):
        x = xa[_PAD:_PAD + H, :]                                # pre-ReLU x (skip)
        xr = jnp.maximum(xa[_PAD - 1:_PAD + H + 1, :], 0.0)     # ReLU(x) + zero halo
        h = dot(xr[0:H, :], m3[0])
        h = h + dot(xr[1:H + 1, :], m3[1])
        h = h + dot(xr[2:H + 2, :], m3[2])
        h = h + b3[...]
        y = x + dot(jnp.maximum(h, 0.0), m1[...]) + b1[...]
        xa[_PAD:_PAD + H, :] = y

    residual(r1m3, r1b3, r1m1, r1b1)
    residual(r2m3, r2b3, r2m1, r2b1)

    # conv1 = ConvTranspose2d(C, C, 4, stride=2, pad=1) on ReLU(x), polyphase rows:
    #   Y[2m]   = X[m-1] @ K3 + X[m]   @ K1
    #   Y[2m+1] = X[m]   @ K2 + X[m+1] @ K0
    xr = jnp.maximum(xa[_PAD - 1:_PAD + H + 1, :], 0.0)         # rows -1..H, ReLU'd
    y0 = dot(xr[0:H, :], c1m[3]) + dot(xr[1:H + 1, :], c1m[1]) + c1b[...]
    y1 = dot(xr[1:H + 1, :], c1m[2]) + dot(xr[2:H + 2, :], c1m[0]) + c1b[...]

    # Store ReLU'd phase planes (row-padded) for conv2.
    p0[...] = jnp.zeros_like(p0)
    p1[...] = jnp.zeros_like(p1)
    p0[_PAD:_PAD + H, :] = jnp.maximum(y0, 0.0)
    p1[_PAD:_PAD + H, :] = jnp.maximum(y1, 0.0)

    # conv2 = ConvTranspose2d(C, Co, 4, stride=2, pad=1) on Y = ReLU(conv1(x)).
    # With Y split into row phases P0 = Y[0::2], P1 = Y[1::2], the 4H output
    # rows split into 4 phases (t = 0..H-1):
    #   oy = 4t+0 : P1[t-1] @ K3 + P0[t]   @ K1
    #   oy = 4t+1 : P0[t]   @ K2 + P1[t]   @ K0
    #   oy = 4t+2 : P0[t]   @ K3 + P1[t]   @ K1
    #   oy = 4t+3 : P1[t]   @ K2 + P0[t+1] @ K0
    q0 = p0[_PAD:_PAD + H, :]                   # P0[t]
    q0n = p0[_PAD + 1:_PAD + H + 1, :]          # P0[t+1] (last row is zero pad)
    q1 = p1[_PAD:_PAD + H, :]                   # P1[t]
    q1p = p1[_PAD - 1:_PAD + H - 1, :]          # P1[t-1] (first row is zero pad)

    r0 = dot(q1p, c2m[3]) + dot(q0, c2m[1]) + c2b[...]
    r1 = dot(q0, c2m[2]) + dot(q1, c2m[0]) + c2b[...]
    r2 = dot(q0, c2m[3]) + dot(q1, c2m[1]) + c2b[...]
    r3 = dot(q1, c2m[2]) + dot(q0n, c2m[0]) + c2b[...]

    # Lane-dense stores: each row-phase is an (H, 4W*Cout) slab.
    o_ref[0, 0, :, :] = r0.astype(o_ref.dtype)
    o_ref[0, 1, :, :] = r1.astype(o_ref.dtype)
    o_ref[0, 2, :, :] = r2.astype(o_ref.dtype)
    o_ref[0, 3, :, :] = r3.astype(o_ref.dtype)


# ----------------------------------------------------------------------------
# Public forward (NCHW in / NCHW out, matching the PyTorch module).
# ----------------------------------------------------------------------------
def quarter_decoder_forward(x_nchw, packed, *, out_channels):
    N, C, H, W = x_nchw.shape
    Co = out_channels
    WC, W2C, W3Co = W * C, 2 * W * C, 4 * W * Co

    # NCHW -> lane-dense (N, H, W*C) slabs.
    x2 = jnp.transpose(x_nchw, (0, 2, 3, 1)).reshape(N, H, WC)

    kernel = functools.partial(_decoder_kernel, H)
    const2 = lambda n: (0, 0)
    const3 = lambda n: (0, 0, 0)

    in_specs = [
        pl.BlockSpec((1, H, WC), lambda n: (n, 0, 0)),
        pl.BlockSpec((3, WC, WC), const3), pl.BlockSpec((1, WC), const2),
        pl.BlockSpec((WC, WC), const2), pl.BlockSpec((1, WC), const2),
        pl.BlockSpec((3, WC, WC), const3), pl.BlockSpec((1, WC), const2),
        pl.BlockSpec((WC, WC), const2), pl.BlockSpec((1, WC), const2),
        pl.BlockSpec((4, WC, W2C), const3), pl.BlockSpec((1, W2C), const2),
        pl.BlockSpec((4, W2C, W3Co), const3), pl.BlockSpec((1, W3Co), const2),
    ]

    out = pl.pallas_call(
        kernel,
        out_shape=jax.ShapeDtypeStruct((N, 4, H, W3Co), x_nchw.dtype),
        grid=(N,),
        in_specs=in_specs,
        out_specs=pl.BlockSpec((1, 4, H, W3Co), lambda n: (n, 0, 0, 0)),
        scratch_shapes=[
            pltpu.VMEM((2 * _PAD + H, WC), jnp.float32),    # residual stage
            pltpu.VMEM((2 * _PAD + H, W2C), jnp.float32),   # conv1 out, row-phase 0
            pltpu.VMEM((2 * _PAD + H, W2C), jnp.float32),   # conv1 out, row-phase 1
        ],
        compiler_params=pltpu.CompilerParams(
            dimension_semantics=("parallel",)),
    )(x2, packed["r1m3"], packed["r1b3"], packed["r1m1"], packed["r1b1"],
      packed["r2m3"], packed["r2b3"], packed["r2m1"], packed["r2b1"],
      packed["c1m"], packed["c1b"], packed["c2m"], packed["c2b"])

    # (N, 4, H, 4W*Co) row-phase slabs -> NCHW (N, Co, 4H, 4W).
    y = out.reshape(N, 4, H, 4 * W, Co)
    y = jnp.transpose(y, (0, 4, 2, 1, 3))       # (n, co, t, phase, ox)
    return y.reshape(N, Co, 4 * H, 4 * W)       # oy = 4*t + phase


# ----------------------------------------------------------------------------
# Pure-JAX reference (for correctness), from PyTorch-native weight layouts.
# ----------------------------------------------------------------------------
def quarter_decoder_reference(x_nchw, params):
    x = jnp.transpose(x_nchw, (0, 2, 3, 1))

    def conv(x, w_oihw, b, pad):
        w = jnp.transpose(w_oihw, (2, 3, 1, 0))
        y = lax.conv_general_dilated(x, w, (1, 1), ((pad, pad), (pad, pad)),
                                     dimension_numbers=("NHWC", "HWIO", "NHWC"))
        return y + b

    def convT(x, w_iohw, b):
        w = jnp.flip(jnp.transpose(w_iohw, (2, 3, 0, 1)), axis=(0, 1))
        y = lax.conv_general_dilated(x, w, (1, 1), ((2, 2), (2, 2)),
                                     lhs_dilation=(2, 2),
                                     dimension_numbers=("NHWC", "HWIO", "NHWC"))
        return y + b

    def res(x, w3, b3, w1, b1):
        h = conv(jax.nn.relu(x), w3, b3, 1)
        return x + conv(jax.nn.relu(h), w1, b1, 0)

    p = params
    x = res(x, p["res1_w3"], p["res1_b3"], p["res1_w1"], p["res1_b1"])
    x = res(x, p["res2_w3"], p["res2_b3"], p["res2_w1"], p["res2_b1"])
    x = convT(jax.nn.relu(x), p["ct1_w"], p["ct1_b"])
    x = convT(jax.nn.relu(x), p["ct2_w"], p["ct2_b"])
    return jnp.transpose(x, (0, 3, 1, 2))


# ----------------------------------------------------------------------------
# Deterministic params in PyTorch-native layouts (QuarterDecoder.__init__ shapes)
# ----------------------------------------------------------------------------
def init_params(key, in_channels, out_channels):
    C, Co = in_channels, out_channels
    ks = jax.random.split(key, 12)
    n = lambda k, s, scale=0.1: (scale * jax.random.normal(k, s)).astype(jnp.float32)
    return {
        "res1_w3": n(ks[0], (C, C, 3, 3)), "res1_b3": n(ks[1], (C,)),
        "res1_w1": n(ks[2], (C, C, 1, 1)), "res1_b1": n(ks[3], (C,)),
        "res2_w3": n(ks[4], (C, C, 3, 3)), "res2_b3": n(ks[5], (C,)),
        "res2_w1": n(ks[6], (C, C, 1, 1)), "res2_b1": n(ks[7], (C,)),
        "ct1_w": n(ks[8], (C, C, 4, 4)), "ct1_b": n(ks[9], (C,)),
        "ct2_w": n(ks[10], (C, Co, 4, 4)), "ct2_b": n(ks[11], (Co,)),
    }


if __name__ == "__main__":
    in_channels, out_channels = 8, 4
    N, H, W = 2, 8, 8

    key = jax.random.PRNGKey(0)
    k_x, k_p = jax.random.split(key)
    x = jax.random.normal(k_x, (N, in_channels, H, W), dtype=jnp.float32)  # NCHW
    params = init_params(k_p, in_channels, out_channels)
    packed = pack_decoder_params(params, H, W)

    fwd = jax.jit(functools.partial(quarter_decoder_forward,
                                    out_channels=out_channels))
    out = jax.block_until_ready(fwd(x, packed))
    assert out.shape == (N, out_channels, 4 * H, 4 * W), out.shape

    ref = jax.block_until_ready(quarter_decoder_reference(x, params))
    err = float(jnp.max(jnp.abs(out - ref)))
    assert jnp.allclose(out, ref, atol=1e-3, rtol=1e-3), err

    print("KERNEL_OK")
</pallas_src>

<mosaic_0001>
module attributes {stable_mosaic.version = 11 : i64} {
  func.func @_decoder_kernel(%arg0: i32, %arg1: memref<1x8x64xf32, #tpu.memory_space<vmem>>, %arg2: memref<3x64x64xf32, #tpu.memory_space<vmem>>, %arg3: memref<1x64xf32, #tpu.memory_space<vmem>>, %arg4: memref<64x64xf32, #tpu.memory_space<vmem>>, %arg5: memref<1x64xf32, #tpu.memory_space<vmem>>, %arg6: memref<3x64x64xf32, #tpu.memory_space<vmem>>, %arg7: memref<1x64xf32, #tpu.memory_space<vmem>>, %arg8: memref<64x64xf32, #tpu.memory_space<vmem>>, %arg9: memref<1x64xf32, #tpu.memory_space<vmem>>, %arg10: memref<4x64x128xf32, #tpu.memory_space<vmem>>, %arg11: memref<1x128xf32, #tpu.memory_space<vmem>>, %arg12: memref<4x128x128xf32, #tpu.memory_space<vmem>>, %arg13: memref<1x128xf32, #tpu.memory_space<vmem>>, %arg14: memref<1x4x8x128xf32, #tpu.memory_space<vmem>>, %arg15: memref<24x64xf32, #tpu.memory_space<vmem>>, %arg16: memref<24x128xf32, #tpu.memory_space<vmem>>, %arg17: memref<24x128xf32, #tpu.memory_space<vmem>>) attributes {dimension_semantics = [#tpu.dimension_semantics<parallel>], iteration_bounds = array<i64: 2>, scalar_prefetch = 0 : i64, scratch_operands = 3 : i64, tpu.core_type = #tpu.core_type<tc>, window_params = [{transform_indices = @transform_0, window_bounds = array<i64: 1, 8, 64>}, {pipeline_mode = #tpu.pipeline_mode<synchronous>, transform_indices = @transform_1, window_bounds = array<i64: 3, 64, 64>}, {pipeline_mode = #tpu.pipeline_mode<synchronous>, transform_indices = @transform_2, window_bounds = array<i64: 1, 64>}, {pipeline_mode = #tpu.pipeline_mode<synchronous>, transform_indices = @transform_3, window_bounds = array<i64: 64, 64>}, {pipeline_mode = #tpu.pipeline_mode<synchronous>, transform_indices = @transform_4, window_bounds = array<i64: 1, 64>}, {pipeline_mode = #tpu.pipeline_mode<synchronous>, transform_indices = @transform_5, window_bounds = array<i64: 3, 64, 64>}, {pipeline_mode = #tpu.pipeline_mode<synchronous>, transform_indices = @transform_6, window_bounds = array<i64: 1, 64>}, {pipeline_mode = #tpu.pipeline_mode<synchronous>, transform_indices = @transform_7, window_bounds = array<i64: 64, 64>}, {pipeline_mode = #tpu.pipeline_mode<synchronous>, transform_indices = @transform_8, window_bounds = array<i64: 1, 64>}, {pipeline_mode = #tpu.pipeline_mode<synchronous>, transform_indices = @transform_9, window_bounds = array<i64: 4, 64, 128>}, {pipeline_mode = #tpu.pipeline_mode<synchronous>, transform_indices = @transform_10, window_bounds = array<i64: 1, 128>}, {pipeline_mode = #tpu.pipeline_mode<synchronous>, transform_indices = @transform_11, window_bounds = array<i64: 4, 128, 128>}, {pipeline_mode = #tpu.pipeline_mode<synchronous>, transform_indices = @transform_12, window_bounds = array<i64: 1, 128>}, {transform_indices = @transform_13, window_bounds = array<i64: 1, 4, 8, 128>}]} {
    %cst = arith.constant 0.000000e+00 : f32
    %0 = vector.broadcast %cst : f32 to vector<24x64xf32>
    %c0 = arith.constant 0 : index
    %c0_0 = arith.constant 0 : index
    %1 = vector.load %arg15[%c0, %c0_0] : memref<24x64xf32, #tpu.memory_space<vmem>>, vector<24x64xf32>
    tpu.vector_store %arg15[%c0, %c0_0], %0 {strides = array<i32>} : memref<24x64xf32, #tpu.memory_space<vmem>>, vector<24x64xf32>,
    %c0_1 = arith.constant 0 : index
    %c0_2 = arith.constant 0 : index
    %c0_3 = arith.constant 0 : index
    %2 = vector.load %arg1[%c0_1, %c0_2, %c0_3] : memref<1x8x64xf32, #tpu.memory_space<vmem>>, vector<1x8x64xf32>
    %3 = vector.shape_cast %2 : vector<1x8x64xf32> to vector<8x64xf32>
    %c8 = arith.constant 8 : index
    %c0_4 = arith.constant 0 : index
    %4 = vector.load %arg15[%c8, %c0_4] : memref<24x64xf32, #tpu.memory_space<vmem>>, vector<8x64xf32>
    tpu.vector_store %arg15[%c8, %c0_4], %3 {strides = array<i32>} : memref<24x64xf32, #tpu.memory_space<vmem>>, vector<8x64xf32>,
    %c8_5 = arith.constant 8 : index
    %c0_6 = arith.constant 0 : index
    %5 = vector.load %arg15[%c8_5, %c0_6] : memref<24x64xf32, #tpu.memory_space<vmem>>, vector<8x64xf32>
    %c7 = arith.constant 7 : index
    %c0_7 = arith.constant 0 : index
    %6 = vector.load %arg15[%c7, %c0_7] : memref<24x64xf32, #tpu.memory_space<vmem>>, vector<10x64xf32>
    %cst_8 = arith.constant 0.000000e+00 : f32
    %7 = vector.broadcast %cst_8 : f32 to vector<10x64xf32>
    %8 = arith.maximumf %6, %7 : vector<10x64xf32>
    %9 = vector.extract_strided_slice %8 {offsets = [0, 0], sizes = [8, 64], strides = [1, 1]} : vector<10x64xf32> to vector<8x64xf32>
    %c0_9 = arith.constant 0 : index
    %c0_10 = arith.constant 0 : index
    %c0_11 = arith.constant 0 : index
    %10 = vector.load %arg2[%c0_9, %c0_10, %c0_11] : memref<3x64x64xf32, #tpu.memory_space<vmem>>, vector<1x64x64xf32>
    %11 = vector.shape_cast %10 : vector<1x64x64xf32> to vector<64x64xf32>
    %cst_12 = arith.constant dense<0.000000e+00> : vector<8x64xf32>
    %12 = tpu.matmul %9, %11, %cst_12 {dimension_numbers = #tpu.dot_dimension_numbers<[1], [0], [0], [1], [0, 0, 1, 1], [], []>} : vector<8x64xf32>, vector<64x64xf32>, vector<8x64xf32> -> vector<8x64xf32>
    %13 = vector.extract_strided_slice %8 {offsets = [1, 0], sizes = [8, 64], strides = [1, 1]} : vector<10x64xf32> to vector<8x64xf32>
    %c1 = arith.constant 1 : index
    %c0_13 = arith.constant 0 : index
    %c0_14 = arith.constant 0 : index
    %14 = vector.load %arg2[%c1, %c0_13, %c0_14] : memref<3x64x64xf32, #tpu.memory_space<vmem>>, vector<1x64x64xf32>
    %15 = vector.shape_cast %14 : vector<1x64x64xf32> to vector<64x64xf32>
    %cst_15 = arith.constant dense<0.000000e+00> : vector<8x64xf32>
    %16 = tpu.matmul %13, %15, %cst_15 {dimension_numbers = #tpu.dot_dimension_numbers<[1], [0], [0], [1], [0, 0, 1, 1], [], []>} : vector<8x64xf32>, vector<64x64xf32>, vector<8x64xf32> -> vector<8x64xf32>
    %17 = arith.addf %12, %16 : vector<8x64xf32>
    %18 = vector.extract_strided_slice %8 {offsets = [2, 0], sizes = [8, 64], strides = [1, 1]} : vector<10x64xf32> to vector<8x64xf32>
    %c2 = arith.constant 2 : index
    %c0_16 = arith.constant 0 : index
    %c0_17 = arith.constant 0 : index
    %19 = vector.load %arg2[%c2, %c0_16, %c0_17] : memref<3x64x64xf32, #tpu.memory_space<vmem>>, vector<1x64x64xf32>
    %20 = vector.shape_cast %19 : vector<1x64x64xf32> to vector<64x64xf32>
    %cst_18 = arith.constant dense<0.000000e+00> : vector<8x64xf32>
    %21 = tpu.matmul %18, %20, %cst_18 {dimension_numbers = #tpu.dot_dimension_numbers<[1], [0], [0], [1], [0, 0, 1, 1], [], []>} : vector<8x64xf32>, vector<64x64xf32>, vector<8x64xf32> -> vector<8x64xf32>
    %22 = arith.addf %17, %21 : vector<8x64xf32>
    %c0_19 = arith.constant 0 : index
    %c0_20 = arith.constant 0 : index
    %23 = vector.load %arg3[%c0_19, %c0_20] : memref<1x64xf32, #tpu.memory_space<vmem>>, vector<1x64xf32>
    %24 = vector.broadcast %23 : vector<1x64xf32> to vector<8x64xf32>
    %25 = arith.addf %22, %24 : vector<8x64xf32>
    %cst_21 = arith.constant 0.000000e+00 : f32
    %26 = vector.broadcast %cst_21 : f32 to vector<8x64xf32>
    %27 = arith.maximumf %25, %26 : vector<8x64xf32>
    %c0_22 = arith.constant 0 : index
    %c0_23 = arith.constant 0 : index
    %28 = vector.load %arg4[%c0_22, %c0_23] : memref<64x64xf32, #tpu.memory_space<vmem>>, vector<64x64xf32>
    %cst_24 = arith.constant dense<0.000000e+00> : vector<8x64xf32>
    %29 = tpu.matmul %27, %28, %cst_24 {dimension_numbers = #tpu.dot_dimension_numbers<[1], [0], [0], [1], [0, 0, 1, 1], [], []>} : vector<8x64xf32>, vector<64x64xf32>, vector<8x64xf32> -> vector<8x64xf32>
    %30 = arith.addf %5, %29 : vector<8x64xf32>
    %c0_25 = arith.constant 0 : index
    %c0_26 = arith.constant 0 : index
    %31 = vector.load %arg5[%c0_25, %c0_26] : memref<1x64xf32, #tpu.memory_space<vmem>>, vector<1x64xf32>
    %32 = vector.broadcast %31 : vector<1x64xf32> to vector<8x64xf32>
    %33 = arith.addf %30, %32 : vector<8x64xf32>
    %c8_27 = arith.constant 8 : index
    %c0_28 = arith.constant 0 : index
    %34 = vector.load %arg15[%c8_27, %c0_28] : memref<24x64xf32, #tpu.memory_space<vmem>>, vector<8x64xf32>
    tpu.vector_store %arg15[%c8_27, %c0_28], %33 {strides = array<i32>} : memref<24x64xf32, #tpu.memory_space<vmem>>, vector<8x64xf32>,
    %c8_29 = arith.constant 8 : index
    %c0_30 = arith.constant 0 : index
    %35 = vector.load %arg15[%c8_29, %c0_30] : memref<24x64xf32, #tpu.memory_space<vmem>>, vector<8x64xf32>
    %c7_31 = arith.constant 7 : index
    %c0_32 = arith.constant 0 : index
    %36 = vector.load %arg15[%c7_31, %c0_32] : memref<24x64xf32, #tpu.memory_space<vmem>>, vector<10x64xf32>
    %cst_33 = arith.constant 0.000000e+00 : f32
    %37 = vector.broadcast %cst_33 : f32 to vector<10x64xf32>
    %38 = arith.maximumf %36, %37 : vector<10x64xf32>
    %39 = vector.extract_strided_slice %38 {offsets = [0, 0], sizes = [8, 64], strides = [1, 1]} : vector<10x64xf32> to vector<8x64xf32>
    %c0_34 = arith.constant 0 : index
    %c0_35 = arith.constant 0 : index
    %c0_36 = arith.constant 0 : index
    %40 = vector.load %arg6[%c0_34, %c0_35, %c0_36] : memref<3x64x64xf32, #tpu.memory_space<vmem>>, vector<1x64x64xf32>
    %41 = vector.shape_cast %40 : vector<1x64x64xf32> to vector<64x64xf32>
    %cst_37 = arith.constant dense<0.000000e+00> : vector<8x64xf32>
    %42 = tpu.matmul %39, %41, %cst_37 {dimension_numbers = #tpu.dot_dimension_numbers<[1], [0], [0], [1], [0, 0, 1, 1], [], []>} : vector<8x64xf32>, vector<64x64xf32>, vector<8x64xf32> -> vector<8x64xf32>
    %43 = vector.extract_strided_slice %38 {offsets = [1, 0], sizes = [8, 64], strides = [1, 1]} : vector<10x64xf32> to vector<8x64xf32>
    %c1_38 = arith.constant 1 : index
    %c0_39 = arith.constant 0 : index
    %c0_40 = arith.constant 0 : index
    %44 = vector.load %arg6[%c1_38, %c0_39, %c0_40] : memref<3x64x64xf32, #tpu.memory_space<vmem>>, vector<1x64x64xf32>
    %45 = vector.shape_cast %44 : vector<1x64x64xf32> to vector<64x64xf32>
    %cst_41 = arith.constant dense<0.000000e+00> : vector<8x64xf32>
    %46 = tpu.matmul %43, %45, %cst_41 {dimension_numbers = #tpu.dot_dimension_numbers<[1], [0], [0], [1], [0, 0, 1, 1], [], []>} : vector<8x64xf32>, vector<64x64xf32>, vector<8x64xf32> -> vector<8x64xf32>
    %47 = arith.addf %42, %46 : vector<8x64xf32>
    %48 = vector.extract_strided_slice %38 {offsets = [2, 0], sizes = [8, 64], strides = [1, 1]} : vector<10x64xf32> to vector<8x64xf32>
    %c2_42 = arith.constant 2 : index
    %c0_43 = arith.constant 0 : index
    %c0_44 = arith.constant 0 : index
    %49 = vector.load %arg6[%c2_42, %c0_43, %c0_44] : memref<3x64x64xf32, #tpu.memory_space<vmem>>, vector<1x64x64xf32>
    %50 = vector.shape_cast %49 : vector<1x64x64xf32> to vector<64x64xf32>
    %cst_45 = arith.constant dense<0.000000e+00> : vector<8x64xf32>
    %51 = tpu.matmul %48, %50, %cst_45 {dimension_numbers = #tpu.dot_dimension_numbers<[1], [0], [0], [1], [0, 0, 1, 1], [], []>} : vector<8x64xf32>, vector<64x64xf32>, vector<8x64xf32> -> vector<8x64xf32>
    %52 = arith.addf %47, %51 : vector<8x64xf32>
    %c0_46 = arith.constant 0 : index
    %c0_47 = arith.constant 0 : index
    %53 = vector.load %arg7[%c0_46, %c0_47] : memref<1x64xf32, #tpu.memory_space<vmem>>, vector<1x64xf32>
    %54 = vector.broadcast %53 : vector<1x64xf32> to vector<8x64xf32>
    %55 = arith.addf %52, %54 : vector<8x64xf32>
    %cst_48 = arith.constant 0.000000e+00 : f32
    %56 = vector.broadcast %cst_48 : f32 to vector<8x64xf32>
    %57 = arith.maximumf %55, %56 : vector<8x64xf32>
    %c0_49 = arith.constant 0 : index
    %c0_50 = arith.constant 0 : index
    %58 = vector.load %arg8[%c0_49, %c0_50] : memref<64x64xf32, #tpu.memory_space<vmem>>, vector<64x64xf32>
    %cst_51 = arith.constant dense<0.000000e+00> : vector<8x64xf32>
    %59 = tpu.matmul %57, %58, %cst_51 {dimension_numbers = #tpu.dot_dimension_numbers<[1], [0], [0], [1], [0, 0, 1, 1], [], []>} : vector<8x64xf32>, vector<64x64xf32>, vector<8x64xf32> -> vector<8x64xf32>
    %60 = arith.addf %35, %59 : vector<8x64xf32>
    %c0_52 = arith.constant 0 : index
    %c0_53 = arith.constant 0 : index
    %61 = vector.load %arg9[%c0_52, %c0_53] : memref<1x64xf32, #tpu.memory_space<vmem>>, vector<1x64xf32>
    %62 = vector.broadcast %61 : vector<1x64xf32> to vector<8x64xf32>
    %63 = arith.addf %60, %62 : vector<8x64xf32>
    %c8_54 = arith.constant 8 : index
    %c0_55 = arith.constant 0 : index
    %64 = vector.load %arg15[%c8_54, %c0_55] : memref<24x64xf32, #tpu.memory_space<vmem>>, vector<8x64xf32>
    tpu.vector_store %arg15[%c8_54, %c0_55], %63 {strides = array<i32>} : memref<24x64xf32, #tpu.memory_space<vmem>>, vector<8x64xf32>,
    %c7_56 = arith.constant 7 : index
    %c0_57 = arith.constant 0 : index
    %65 = vector.load %arg15[%c7_56, %c0_57] : memref<24x64xf32, #tpu.memory_space<vmem>>, vector<10x64xf32>
    %cst_58 = arith.constant 0.000000e+00 : f32
    %66 = vector.broadcast %cst_58 : f32 to vector<10x64xf32>
    %67 = arith.maximumf %65, %66 : vector<10x64xf32>
    %68 = vector.extract_strided_slice %67 {offsets = [0, 0], sizes = [8, 64], strides = [1, 1]} : vector<10x64xf32> to vector<8x64xf32>
    %c3 = arith.constant 3 : index
    %c0_59 = arith.constant 0 : index
    %c0_60 = arith.constant 0 : index
    %69 = vector.load %arg10[%c3, %c0_59, %c0_60] : memref<4x64x128xf32, #tpu.memory_space<vmem>>, vector<1x64x128xf32>
    %70 = vector.shape_cast %69 : vector<1x64x128xf32> to vector<64x128xf32>
    %cst_61 = arith.constant dense<0.000000e+00> : vector<8x128xf32>
    %71 = tpu.matmul %68, %70, %cst_61 {dimension_numbers = #tpu.dot_dimension_numbers<[1], [0], [0], [1], [0, 0, 1, 1], [], []>} : vector<8x64xf32>, vector<64x128xf32>, vector<8x128xf32> -> vector<8x128xf32>
    %72 = vector.extract_strided_slice %67 {offsets = [1, 0], sizes = [8, 64], strides = [1, 1]} : vector<10x64xf32> to vector<8x64xf32>
    %c1_62 = arith.constant 1 : index
    %c0_63 = arith.constant 0 : index
    %c0_64 = arith.constant 0 : index
    %73 = vector.load %arg10[%c1_62, %c0_63, %c0_64] : memref<4x64x128xf32, #tpu.memory_space<vmem>>, vector<1x64x128xf32>
    %74 = vector.shape_cast %73 : vector<1x64x128xf32> to vector<64x128xf32>
    %cst_65 = arith.constant dense<0.000000e+00> : vector<8x128xf32>
    %75 = tpu.matmul %72, %74, %cst_65 {dimension_numbers = #tpu.dot_dimension_numbers<[1], [0], [0], [1], [0, 0, 1, 1], [], []>} : vector<8x64xf32>, vector<64x128xf32>, vector<8x128xf32> -> vector<8x128xf32>
    %76 = arith.addf %71, %75 : vector<8x128xf32>
    %c0_66 = arith.constant 0 : index
    %c0_67 = arith.constant 0 : index
    %77 = vector.load %arg11[%c0_66, %c0_67] : memref<1x128xf32, #tpu.memory_space<vmem>>, vector<1x128xf32>
    %78 = vector.broadcast %77 : vector<1x128xf32> to vector<8x128xf32>
    %79 = arith.addf %76, %78 : vector<8x128xf32>
    %80 = vector.extract_strided_slice %67 {offsets = [1, 0], sizes = [8, 64], strides = [1, 1]} : vector<10x64xf32> to vector<8x64xf32>
    %c2_68 = arith.constant 2 : index
    %c0_69 = arith.constant 0 : index
    %c0_70 = arith.constant 0 : index
    %81 = vector.load %arg10[%c2_68, %c0_69, %c0_70] : memref<4x64x128xf32, #tpu.memory_space<vmem>>, vector<1x64x128xf32>
    %82 = vector.shape_cast %81 : vector<1x64x128xf32> to vector<64x128xf32>
    %cst_71 = arith.constant dense<0.000000e+00> : vector<8x128xf32>
    %83 = tpu.matmul %80, %82, %cst_71 {dimension_numbers = #tpu.dot_dimension_numbers<[1], [0], [0], [1], [0, 0, 1, 1], [], []>} : vector<8x64xf32>, vector<64x128xf32>, vector<8x128xf32> -> vector<8x128xf32>
    %84 = vector.extract_strided_slice %67 {offsets = [2, 0], sizes = [8, 64], strides = [1, 1]} : vector<10x64xf32> to vector<8x64xf32>
    %c0_72 = arith.constant 0 : index
    %c0_73 = arith.constant 0 : index
    %c0_74 = arith.constant 0 : index
    %85 = vector.load %arg10[%c0_72, %c0_73, %c0_74] : memref<4x64x128xf32, #tpu.memory_space<vmem>>, vector<1x64x128xf32>
    %86 = vector.shape_cast %85 : vector<1x64x128xf32> to vector<64x128xf32>
    %cst_75 = arith.constant dense<0.000000e+00> : vector<8x128xf32>
    %87 = tpu.matmul %84, %86, %cst_75 {dimension_numbers = #tpu.dot_dimension_numbers<[1], [0], [0], [1], [0, 0, 1, 1], [], []>} : vector<8x64xf32>, vector<64x128xf32>, vector<8x128xf32> -> vector<8x128xf32>
    %88 = arith.addf %83, %87 : vector<8x128xf32>
    %c0_76 = arith.constant 0 : index
    %c0_77 = arith.constant 0 : index
    %89 = vector.load %arg11[%c0_76, %c0_77] : memref<1x128xf32, #tpu.memory_space<vmem>>, vector<1x128xf32>
    %90 = vector.broadcast %89 : vector<1x128xf32> to vector<8x128xf32>
    %91 = arith.addf %88, %90 : vector<8x128xf32>
    %cst_78 = arith.constant 0.000000e+00 : f32
    %92 = vector.broadcast %cst_78 : f32 to vector<24x128xf32>
    %c0_79 = arith.constant 0 : index
    %c0_80 = arith.constant 0 : index
    %93 = vector.load %arg16[%c0_79, %c0_80] : memref<24x128xf32, #tpu.memory_space<vmem>>, vector<24x128xf32>
    tpu.vector_store %arg16[%c0_79, %c0_80], %92 {strides = array<i32>} : memref<24x128xf32, #tpu.memory_space<vmem>>, vector<24x128xf32>,
    %cst_81 = arith.constant 0.000000e+00 : f32
    %94 = vector.broadcast %cst_81 : f32 to vector<24x128xf32>
    %c0_82 = arith.constant 0 : index
    %c0_83 = arith.constant 0 : index
    %95 = vector.load %arg17[%c0_82, %c0_83] : memref<24x128xf32, #tpu.memory_space<vmem>>, vector<24x128xf32>
    tpu.vector_store %arg17[%c0_82, %c0_83], %94 {strides = array<i32>} : memref<24x128xf32, #tpu.memory_space<vmem>>, vector<24x128xf32>,
    %cst_84 = arith.constant 0.000000e+00 : f32
    %96 = vector.broadcast %cst_84 : f32 to vector<8x128xf32>
    %97 = arith.maximumf %79, %96 : vector<8x128xf32>
    %c8_85 = arith.constant 8 : index
    %c0_86 = arith.constant 0 : index
    %98 = vector.load %arg16[%c8_85, %c0_86] : memref<24x128xf32, #tpu.memory_space<vmem>>, vector<8x128xf32>
    tpu.vector_store %arg16[%c8_85, %c0_86], %97 {strides = array<i32>} : memref<24x128xf32, #tpu.memory_space<vmem>>, vector<8x128xf32>,
    %cst_87 = arith.constant 0.000000e+00 : f32
    %99 = vector.broadcast %cst_87 : f32 to vector<8x128xf32>
    %100 = arith.maximumf %91, %99 : vector<8x128xf32>
    %c8_88 = arith.constant 8 : index
    %c0_89 = arith.constant 0 : index
    %101 = vector.load %arg17[%c8_88, %c0_89] : memref<24x128xf32, #tpu.memory_space<vmem>>, vector<8x128xf32>
    tpu.vector_store %arg17[%c8_88, %c0_89], %100 {strides = array<i32>} : memref<24x128xf32, #tpu.memory_space<vmem>>, vector<8x128xf32>,
    %c8_90 = arith.constant 8 : index
    %c0_91 = arith.constant 0 : index
    %102 = vector.load %arg16[%c8_90, %c0_91] : memref<24x128xf32, #tpu.memory_space<vmem>>, vector<8x128xf32>
    %c9 = arith.constant 9 : index
    %c0_92 = arith.constant 0 : index
    %103 = vector.load %arg16[%c9, %c0_92] : memref<24x128xf32, #tpu.memory_space<vmem>>, vector<8x128xf32>
    %c8_93 = arith.constant 8 : index
    %c0_94 = arith.constant 0 : index
    %104 = vector.load %arg17[%c8_93, %c0_94] : memref<24x128xf32, #tpu.memory_space<vmem>>, vector<8x128xf32>
    %c7_95 = arith.constant 7 : index
    %c0_96 = arith.constant 0 : index
    %105 = vector.load %arg17[%c7_95, %c0_96] : memref<24x128xf32, #tpu.memory_space<vmem>>, vector<8x128xf32>
    %c3_97 = arith.constant 3 : index
    %c0_98 = arith.constant 0 : index
    %c0_99 = arith.constant 0 : index
    %106 = vector.load %arg12[%c3_97, %c0_98, %c0_99] : memref<4x128x128xf32, #tpu.memory_space<vmem>>, vector<1x128x128xf32>
    %107 = vector.shape_cast %106 : vector<1x128x128xf32> to vector<128x128xf32>
    %cst_100 = arith.constant dense<0.000000e+00> : vector<8x128xf32>
    %108 = tpu.matmul %105, %107, %cst_100 {dimension_numbers = #tpu.dot_dimension_numbers<[1], [0], [0], [1], [0, 0, 1, 1], [], []>} : vector<8x128xf32>, vector<128x128xf32>, vector<8x128xf32> -> vector<8x128xf32>
    %c1_101 = arith.constant 1 : index
    %c0_102 = arith.constant 0 : index
    %c0_103 = arith.constant 0 : index
    %109 = vector.load %arg12[%c1_101, %c0_102, %c0_103] : memref<4x128x128xf32, #tpu.memory_space<vmem>>, vector<1x128x128xf32>
    %110 = vector.shape_cast %109 : vector<1x128x128xf32> to vector<128x128xf32>
    %cst_104 = arith.constant dense<0.000000e+00> : vector<8x128xf32>
    %111 = tpu.matmul %102, %110, %cst_104 {dimension_numbers = #tpu.dot_dimension_numbers<[1], [0], [0], [1], [0, 0, 1, 1], [], []>} : vector<8x128xf32>, vector<128x128xf32>, vector<8x128xf32> -> vector<8x128xf32>
    %112 = arith.addf %108, %111 : vector<8x128xf32>
    %c0_105 = arith.constant 0 : index
    %c0_106 = arith.constant 0 : index
    %113 = vector.load %arg13[%c0_105, %c0_106] : memref<1x128xf32, #tpu.memory_space<vmem>>, vector<1x128xf32>
    %114 = vector.broadcast %113 : vector<1x128xf32> to vector<8x128xf32>
    %115 = arith.addf %112, %114 : vector<8x128xf32>
    %c2_107 = arith.constant 2 : index
    %c0_108 = arith.constant 0 : index
    %c0_109 = arith.constant 0 : index
    %116 = vector.load %arg12[%c2_107, %c0_108, %c0_109] : memref<4x128x128xf32, #tpu.memory_space<vmem>>, vector<1x128x128xf32>
    %117 = vector.shape_cast %116 : vector<1x128x128xf32> to vector<128x128xf32>
    %cst_110 = arith.constant dense<0.000000e+00> : vector<8x128xf32>
    %118 = tpu.matmul %102, %117, %cst_110 {dimension_numbers = #tpu.dot_dimension_numbers<[1], [0], [0], [1], [0, 0, 1, 1], [], []>} : vector<8x128xf32>, vector<128x128xf32>, vector<8x128xf32> -> vector<8x128xf32>
    %c0_111 = arith.constant 0 : index
    %c0_112 = arith.constant 0 : index
    %c0_113 = arith.constant 0 : index
    %119 = vector.load %arg12[%c0_111, %c0_112, %c0_113] : memref<4x128x128xf32, #tpu.memory_space<vmem>>, vector<1x128x128xf32>
    %120 = vector.shape_cast %119 : vector<1x128x128xf32> to vector<128x128xf32>
    %cst_114 = arith.constant dense<0.000000e+00> : vector<8x128xf32>
    %121 = tpu.matmul %104, %120, %cst_114 {dimension_numbers = #tpu.dot_dimension_numbers<[1], [0], [0], [1], [0, 0, 1, 1], [], []>} : vector<8x128xf32>, vector<128x128xf32>, vector<8x128xf32> -> vector<8x128xf32>
    %122 = arith.addf %118, %121 : vector<8x128xf32>
    %c0_115 = arith.constant 0 : index
    %c0_116 = arith.constant 0 : index
    %123 = vector.load %arg13[%c0_115, %c0_116] : memref<1x128xf32, #tpu.memory_space<vmem>>, vector<1x128xf32>
    %124 = vector.broadcast %123 : vector<1x128xf32> to vector<8x128xf32>
    %125 = arith.addf %122, %124 : vector<8x128xf32>
    %c3_117 = arith.constant 3 : index
    %c0_118 = arith.constant 0 : index
    %c0_119 = arith.constant 0 : index
    %126 = vector.load %arg12[%c3_117, %c0_118, %c0_119] : memref<4x128x128xf32, #tpu.memory_space<vmem>>, vector<1x128x128xf32>
    %127 = vector.shape_cast %126 : vector<1x128x128xf32> to vector<128x128xf32>
    %cst_120 = arith.constant dense<0.000000e+00> : vector<8x128xf32>
    %128 = tpu.matmul %102, %127, %cst_120 {dimension_numbers = #tpu.dot_dimension_numbers<[1], [0], [0], [1], [0, 0, 1, 1], [], []>} : vector<8x128xf32>, vector<128x128xf32>, vector<8x128xf32> -> vector<8x128xf32>
    %c1_121 = arith.constant 1 : index
    %c0_122 = arith.constant 0 : index
    %c0_123 = arith.constant 0 : index
    %129 = vector.load %arg12[%c1_121, %c0_122, %c0_123] : memref<4x128x128xf32, #tpu.memory_space<vmem>>, vector<1x128x128xf32>
    %130 = vector.shape_cast %129 : vector<1x128x128xf32> to vector<128x128xf32>
    %cst_124 = arith.constant dense<0.000000e+00> : vector<8x128xf32>
    %131 = tpu.matmul %104, %130, %cst_124 {dimension_numbers = #tpu.dot_dimension_numbers<[1], [0], [0], [1], [0, 0, 1, 1], [], []>} : vector<8x128xf32>, vector<128x128xf32>, vector<8x128xf32> -> vector<8x128xf32>
    %132 = arith.addf %128, %131 : vector<8x128xf32>
    %c0_125 = arith.constant 0 : index
    %c0_126 = arith.constant 0 : index
    %133 = vector.load %arg13[%c0_125, %c0_126] : memref<1x128xf32, #tpu.memory_space<vmem>>, vector<1x128xf32>
    %134 = vector.broadcast %133 : vector<1x128xf32> to vector<8x128xf32>
    %135 = arith.addf %132, %134 : vector<8x128xf32>
    %c2_127 = arith.constant 2 : index
    %c0_128 = arith.constant 0 : index
    %c0_129 = arith.constant 0 : index
    %136 = vector.load %arg12[%c2_127, %c0_128, %c0_129] : memref<4x128x128xf32, #tpu.memory_space<vmem>>, vector<1x128x128xf32>
    %137 = vector.shape_cast %136 : vector<1x128x128xf32> to vector<128x128xf32>
    %cst_130 = arith.constant dense<0.000000e+00> : vector<8x128xf32>
    %138 = tpu.matmul %104, %137, %cst_130 {dimension_numbers = #tpu.dot_dimension_numbers<[1], [0], [0], [1], [0, 0, 1, 1], [], []>} : vector<8x128xf32>, vector<128x128xf32>, vector<8x128xf32> -> vector<8x128xf32>
    %c0_131 = arith.constant 0 : index
    %c0_132 = arith.constant 0 : index
    %c0_133 = arith.constant 0 : index
    %139 = vector.load %arg12[%c0_131, %c0_132, %c0_133] : memref<4x128x128xf32, #tpu.memory_space<vmem>>, vector<1x128x128xf32>
    %140 = vector.shape_cast %139 : vector<1x128x128xf32> to vector<128x128xf32>
    %cst_134 = arith.constant dense<0.000000e+00> : vector<8x128xf32>
    %141 = tpu.matmul %103, %140, %cst_134 {dimension_numbers = #tpu.dot_dimension_numbers<[1], [0], [0], [1], [0, 0, 1, 1], [], []>} : vector<8x128xf32>, vector<128x128xf32>, vector<8x128xf32> -> vector<8x128xf32>
    %142 = arith.addf %138, %141 : vector<8x128xf32>
    %c0_135 = arith.constant 0 : index
    %c0_136 = arith.constant 0 : index
    %143 = vector.load %arg13[%c0_135, %c0_136] : memref<1x128xf32, #tpu.memory_space<vmem>>, vector<1x128xf32>
    %144 = vector.broadcast %143 : vector<1x128xf32> to vector<8x128xf32>
    %145 = arith.addf %142, %144 : vector<8x128xf32>
    %c0_137 = arith.constant 0 : index
    %c0_138 = arith.constant 0 : index
    %c0_139 = arith.constant 0 : index
    %c0_140 = arith.constant 0 : index
    %146 = vector.load %arg14[%c0_137, %c0_138, %c0_139, %c0_140] : memref<1x4x8x128xf32, #tpu.memory_space<vmem>>, vector<1x1x8x128xf32>
    %147 = vector.shape_cast %146 : vector<1x1x8x128xf32> to vector<8x128xf32>
    %148 = vector.shape_cast %115 : vector<8x128xf32> to vector<1x1x8x128xf32>
    tpu.vector_store %arg14[%c0_137, %c0_138, %c0_139, %c0_140], %148 {strides = array<i32>} : memref<1x4x8x128xf32, #tpu.memory_space<vmem>>, vector<1x1x8x128xf32>,
    %c0_141 = arith.constant 0 : index
    %c1_142 = arith.constant 1 : index
    %c0_143 = arith.constant 0 : index
    %c0_144 = arith.constant 0 : index
    %149 = vector.load %arg14[%c0_141, %c1_142, %c0_143, %c0_144] : memref<1x4x8x128xf32, #tpu.memory_space<vmem>>, vector<1x1x8x128xf32>
    %150 = vector.shape_cast %149 : vector<1x1x8x128xf32> to vector<8x128xf32>
    %151 = vector.shape_cast %125 : vector<8x128xf32> to vector<1x1x8x128xf32>
    tpu.vector_store %arg14[%c0_141, %c1_142, %c0_143, %c0_144], %151 {strides = array<i32>} : memref<1x4x8x128xf32, #tpu.memory_space<vmem>>, vector<1x1x8x128xf32>,
    %c0_145 = arith.constant 0 : index
    %c2_146 = arith.constant 2 : index
    %c0_147 = arith.constant 0 : index
    %c0_148 = arith.constant 0 : index
    %152 = vector.load %arg14[%c0_145, %c2_146, %c0_147, %c0_148] : memref<1x4x8x128xf32, #tpu.memory_space<vmem>>, vector<1x1x8x128xf32>
    %153 = vector.shape_cast %152 : vector<1x1x8x128xf32> to vector<8x128xf32>
    %154 = vector.shape_cast %135 : vector<8x128xf32> to vector<1x1x8x128xf32>
    tpu.vector_store %arg14[%c0_145, %c2_146, %c0_147, %c0_148], %154 {strides = array<i32>} : memref<1x4x8x128xf32, #tpu.memory_space<vmem>>, vector<1x1x8x128xf32>,
    %c0_149 = arith.constant 0 : index
    %c3_150 = arith.constant 3 : index
    %c0_151 = arith.constant 0 : index
    %c0_152 = arith.constant 0 : index
    %155 = vector.load %arg14[%c0_149, %c3_150, %c0_151, %c0_152] : memref<1x4x8x128xf32, #tpu.memory_space<vmem>>, vector<1x1x8x128xf32>
    %156 = vector.shape_cast %155 : vector<1x1x8x128xf32> to vector<8x128xf32>
    %157 = vector.shape_cast %145 : vector<8x128xf32> to vector<1x1x8x128xf32>
    tpu.vector_store %arg14[%c0_149, %c3_150, %c0_151, %c0_152], %157 {strides = array<i32>} : memref<1x4x8x128xf32, #tpu.memory_space<vmem>>, vector<1x1x8x128xf32>,
    return
  }
  func.func @transform_0(%arg0: i32) -> (i32, i32, i32) {
    %c0_i32 = arith.constant 0 : i32
    %c0_i32_0 = arith.constant 0 : i32
    %c0_i32_1 = arith.constant 0 : i32
    return %arg0, %c0_i32, %c0_i32_0 : i32, i32, i32
  }
  func.func @transform_1(%arg0: i32) -> (i32, i32, i32) {
    %c0_i32 = arith.constant 0 : i32
    %c0_i32_0 = arith.constant 0 : i32
    %c0_i32_1 = arith.constant 0 : i32
    %c0_i32_2 = arith.constant 0 : i32
    return %c0_i32, %c0_i32_0, %c0_i32_1 : i32, i32, i32
  }
  func.func @transform_2(%arg0: i32) -> (i32, i32) {
    %c0_i32 = arith.constant 0 : i32
    %c0_i32_0 = arith.constant 0 : i32
    %c0_i32_1 = arith.constant 0 : i32
    return %c0_i32, %c0_i32_0 : i32, i32
  }
  func.func @transform_3(%arg0: i32) -> (i32, i32) {
    %c0_i32 = arith.constant 0 : i32
    %c0_i32_0 = arith.constant 0 : i32
    %c0_i32_1 = arith.constant 0 : i32
    return %c0_i32, %c0_i32_0 : i32, i32
  }
  func.func @transform_4(%arg0: i32) -> (i32, i32) {
    %c0_i32 = arith.constant 0 : i32
    %c0_i32_0 = arith.constant 0 : i32
    %c0_i32_1 = arith.constant 0 : i32
    return %c0_i32, %c0_i32_0 : i32, i32
  }
  func.func @transform_5(%arg0: i32) -> (i32, i32, i32) {
    %c0_i32 = arith.constant 0 : i32
    %c0_i32_0 = arith.constant 0 : i32
    %c0_i32_1 = arith.constant 0 : i32
    %c0_i32_2 = arith.constant 0 : i32
    return %c0_i32, %c0_i32_0, %c0_i32_1 : i32, i32, i32
  }
  func.func @transform_6(%arg0: i32) -> (i32, i32) {
    %c0_i32 = arith.constant 0 : i32
    %c0_i32_0 = arith.constant 0 : i32
    %c0_i32_1 = arith.constant 0 : i32
    return %c0_i32, %c0_i32_0 : i32, i32
  }
  func.func @transform_7(%arg0: i32) -> (i32, i32) {
    %c0_i32 = arith.constant 0 : i32
    %c0_i32_0 = arith.constant 0 : i32
    %c0_i32_1 = arith.constant 0 : i32
    return %c0_i32, %c0_i32_0 : i32, i32
  }
  func.func @transform_8(%arg0: i32) -> (i32, i32) {
    %c0_i32 = arith.constant 0 : i32
    %c0_i32_0 = arith.constant 0 : i32
    %c0_i32_1 = arith.constant 0 : i32
    return %c0_i32, %c0_i32_0 : i32, i32
  }
  func.func @transform_9(%arg0: i32) -> (i32, i32, i32) {
    %c0_i32 = arith.constant 0 : i32
    %c0_i32_0 = arith.constant 0 : i32
    %c0_i32_1 = arith.constant 0 : i32
    %c0_i32_2 = arith.constant 0 : i32
    return %c0_i32, %c0_i32_0, %c0_i32_1 : i32, i32, i32
  }
  func.func @transform_10(%arg0: i32) -> (i32, i32) {
    %c0_i32 = arith.constant 0 : i32
    %c0_i32_0 = arith.constant 0 : i32
    %c0_i32_1 = arith.constant 0 : i32
    return %c0_i32, %c0_i32_0 : i32, i32
  }
  func.func @transform_11(%arg0: i32) -> (i32, i32, i32) {
    %c0_i32 = arith.constant 0 : i32
    %c0_i32_0 = arith.constant 0 : i32
    %c0_i32_1 = arith.constant 0 : i32
    %c0_i32_2 = arith.constant 0 : i32
    return %c0_i32, %c0_i32_0, %c0_i32_1 : i32, i32, i32
  }
  func.func @transform_12(%arg0: i32) -> (i32, i32) {
    %c0_i32 = arith.constant 0 : i32
    %c0_i32_0 = arith.constant 0 : i32
    %c0_i32_1 = arith.constant 0 : i32
    return %c0_i32, %c0_i32_0 : i32, i32
  }
  func.func @transform_13(%arg0: i32) -> (i32, i32, i32, i32) {
    %c0_i32 = arith.constant 0 : i32
    %c0_i32_0 = arith.constant 0 : i32
    %c0_i32_1 = arith.constant 0 : i32
    %c0_i32_2 = arith.constant 0 : i32
    return %arg0, %c0_i32, %c0_i32_0, %c0_i32_1 : i32, i32, i32, i32
  }
}

</mosaic_0001>

<bundles_post_ra>
// kernel: quarter_decoder_forward.1
= control target key start
LH: loop header
LB: loop body
LE: loop exit
PB: predicated region body
PF: predicated region fallthrough
CT: control target
= control target key end

     0   :  { %18 = vsyncpa [#allocation6], 0  ;;  %s4125_s0 = inlined_call_operand.vmem [shape: f32[2,8,64], index: 0, kind: input, shape index: {}]   ;;  %s4126_s1 = inlined_call_operand.hbm [shape: f32[3,64,64], index: 1, kind: input, shape index: {}]   ;;  %s4127_s2 = inlined_call_operand.vmem [shape: f32[1,64], index: 2, kind: input, shape index: {}]   ;;  %s4128_s3 = inlined_call_operand.vmem [shape: f32[64,64], index: 3, kind: input, shape index: {}]   ;;  %s4129_s4 = inlined_call_operand.vmem [shape: f32[1,64], index: 4, kind: input, shape index: {}]   ;;  %s4130_s5 = inlined_call_operand.hbm [shape: f32[3,64,64], index: 5, kind: input, shape index: {}]   ;;  %s4131_s6 = inlined_call_operand.vmem [shape: f32[1,64], index: 6, kind: input, shape index: {}]   ;;  %s4132_s7 = inlined_call_operand.vmem [shape: f32[64,64], index: 7, kind: input, shape index: {}]   ;;  %s4133_s8 = inlined_call_operand.vmem [shape: f32[1,64], index: 8, kind: input, shape index: {}]   ;;  %s4134_s9 = inlined_call_operand.vmem [shape: f32[4,64,128], index: 9, kind: input, shape index: {}]   ;;  %s4135_s10 = inlined_call_operand.vmem [shape: f32[1,128], index: 10, kind: input, shape index: {}]   ;;  %s4136_s11 = inlined_call_operand.hbm [shape: f32[4,128,128], index: 11, kind: input, shape index: {}]   ;;  %s4137_s12 = inlined_call_operand.vmem [shape: f32[1,128], index: 12, kind: input, shape index: {}]   ;;  %s4138_s13 = inlined_call_operand.vmem [shape: f32[2,4,8,128], index: 13, kind: output, shape index: {}]  }
   0x1   :  { %19 = vsyncpa [#allocation8], 0  ;;  %s3318_s25 = smov 0  }
   0x2 LB: > { %s3324_s26 = sadd.s32 4294967295, %s3239_s25   ;;  %p2291_p0 = scmp.ge.s32.totalorder %s3239_s25, 1  ;;  %s3239_s25 = sphi %s3318_s25, %s25_s25  }
   0x3   : > { %p334_p1 = scmp.lt.s32.totalorder %s3239_s25, 3  ;;  %p3125_p2 = scmp.eq.s32.totalorder %s3324_s26, 0 }
   0x4   : > { %s3241_s28 = smov [#allocation7]   ;;  %s3242_s30 = smov [#allocation5]  }
   0x5   : > { %p3329_p3 = pnand %p2291_p0, %p334_p1  ;;  %s368_s29 = sshll.u32 %s3241_s28, 4  ;;  %s369_s29 = int_to_ptr.vmem [resolvable:$true] %s368_s29 }
   0x6   : > { %s346_s14 = sshll.u32 %s3242_s30, 4  ;;  %s3243_s16 = smov [#allocation9]   ;;  %s347_s14 = int_to_ptr.vmem [resolvable:$true] %s346_s14 }
   0x7   : > { %p3115_p4 = pneg %p3329_p3  ;;  %s396_s17 = sshll.u32 %s3243_s16, 4  ;;  %s3341_s17 = int_to_ptr.vmem [resolvable:$true] %s396_s17 }
   0x8   : > { %s3158_s18 = scalar_lea.vmem %s369_s29, 3072  ;;  %p3166_p10 = scmp.lt.s32.totalorder %s369_s29, %s369_s29 }
   0x9   : > { %p3337_p5 = pnand %p3125_p2, %p3115_p4  ;;  %p3159_p7 = scmp.ne.s32.totalorder %s369_s29, %s3158_s18 }
   0xa   : > { %p3167_p11 = scmp.lt.s32.totalorder %s3158_s18, %s3158_s18 }
   0xb   : > { %p3149_p6 = pneg %p3337_p5 }
   0xc   : > { %p3168_p12 = por %p3167_p11, %p3166_p10 }
   0xd   : > { %p3161_p8 = pnand %p3159_p7, %p3149_p6 }
   0xf   : > { %p3162_p9 = pneg %p3161_p8 }
  0x11   : > { %p3169_p13 = pnand %p3168_p12, %p3162_p9 }
  0x13   : > { %3172 = shalt.err (!%p3169_p13)
}
  0x14   : > { %s3244_s19 = smov 128   ;;  %s3245_s20 = smov 8  }
  0x15   : > { %3121 = dma.hbm_to_vmem [thread:$0]  (!%p3337_p5), %s4130_s5, 3072, %s369_s29, [#allocation8], %s3244_s19, %s3244_s19, %s3245_s20  }
  0x16   : > { %s3184_s23 = scalar_lea.vmem %s347_s14, 3072  ;;  %p3192_p7 = scmp.lt.s32.totalorder %s347_s14, %s347_s14 }
  0x17   : > { %p3185_p0 = scmp.ne.s32.totalorder %s347_s14, %s3184_s23  ;;  %p3193_p8 = scmp.lt.s32.totalorder %s3184_s23, %s3184_s23 }
  0x19   : > { %p3187_p1 = pnand %p3185_p0, %p3149_p6  ;;  %p3194_p10 = por %p3193_p8, %p3192_p7 }
  0x1b   : > { %p3188_p4 = pneg %p3187_p1 }
  0x1d   : > { %p3195_p9 = pnand %p3194_p10, %p3188_p4 }
  0x1f   : > { %3198 = shalt.err (!%p3195_p9)
}
  0x20   : > { %3118 = dma.hbm_to_vmem [thread:$0]  (!%p3337_p5), %s4126_s1, 3072, %s347_s14, [#allocation6], %s3244_s19, %s3244_s19, %s3245_s20  }
  0x21   : > { %s3210_s29 = scalar_lea.vmem %s3341_s17, 8192  ;;  %p3218_p0 = scmp.lt.s32.totalorder %s3341_s17, %s3341_s17 }
  0x22   : > { %p3211_p11 = scmp.ne.s32.totalorder %s3341_s17, %s3210_s29  ;;  %p3219_p1 = scmp.lt.s32.totalorder %s3210_s29, %s3210_s29 }
  0x24   : > { %p3213_p12 = pnand %p3211_p11, %p3149_p6  ;;  %p3220_p4 = por %p3219_p1, %p3218_p0 }
  0x26   : > { %p3214_p13 = pneg %p3213_p12 }
  0x28   : > { %p3221_p7 = pnand %p3220_p4, %p3214_p13 }
  0x2a   : > { %3224 = shalt.err (!%p3221_p7)
}
  0x2b   : > { %3124 = dma.hbm_to_vmem [thread:$0]  (!%p3337_p5), %s4136_s11, 8192, %s3341_s17, [#allocation8], %s3244_s19, %s3244_s19, %s3245_s20  }
  0x2c   : > { %422 = sbr.rel (%p3329_p3) target bundleno = 1439 (0x59f), region = 72 }
  0x31   : > { %3230 = dma.done.wait (%p3125_p2), [#allocation6], 3072  }
  0x32   : > { %3232 = vsyncadd (%p3125_p2), [#allocation6], 4294964224 }
  0x33   : > { %3234 = dma.done.wait (%p3125_p2), [#allocation8], 11264  }
  0x34   : > { %3236 = vsyncadd (%p3125_p2), [#allocation8], 4294956032  ;;  %p473_p6 = scmp.lt.s32.totalorder %s3324_s26, 1  ;;  %vm482_vm0 = vcmask 523264   ;;  %v3246_v0 = vmov 0.0   ;;  %vm3247_vm1 = vmmov 0  }
  0x35   : > { %1544 = vst [vmem:[#allocation3] sm:$0xff] %v3246_v0  ;;  %1546 = vst [vmem:[#allocation3 + $0x10] sm:$0xff] %v3246_v0  ;;  %2595 = vmatprep.subr.mxu0 %v3246_v0  ;;  %2614 = vmatprep.subr.mxu1 %v3246_v0  ;;  %v509_v1 = vld [vmem:[#allocation5 + $0x78] sm:$0xff]  ;;  %v508_v3 = vld [vmem:[#allocation5 + $0x70] sm:$0xff]  ;;  %vm512_vm2 = vcmask 1046528   ;;  %vm669_vm3 = vcmask 1045504  }
  0x36   : > { %1547 = vst [vmem:[#allocation4] sm:$0xff] %v3246_v0  ;;  %483 = vst.msk [vmem:[#allocation2] sm:$0xff] %vm482_vm0, %v3246_v0  ;;  %2611 = vmatprep.mubr.msk.f32.mxu0 %vm3247_vm1, %v3246_v0  ;;  %s4142_s26 = smov (!%p473_p6, %s3324_s26), 1  ;;  %2630 = vmatprep.mubr.msk.f32.mxu1 %vm3247_vm1, %v3246_v0  ;;  %v500_v2 = vld [vmem:[#allocation5 + $0x38] sm:$0xff]  ;;  %v499_v4 = vld [vmem:[#allocation5 + $0x30] sm:$0xff] }
  0x37   : > { %484 = vst.msk [vmem:[#allocation2 + $0x8] sm:$0xff] %vm482_vm0, %v3246_v0  ;;  %485 = vst.msk [vmem:[#allocation2 + $0x10] sm:$0xff] %vm482_vm0, %v3246_v0  ;;  %s2300_s27 = sshll.u32 %s4142_s26, 3  ;;  %2596 = vmatpush3.msra.mxu0 %v509_v1  ;;  %2615 = vmatpush3.msra.mxu1 %v500_v2  ;;  %v507_v5 = vld [vmem:[#allocation5 + $0x68] sm:$0xff]  ;;  %v506_v7 = vld [vmem:[#allocation5 + $0x60] sm:$0xff]  ;;  %s2350_s19 = sshll.u32 %s4142_s26, 5 }
  0x38   : > { %2597 = vmatprep.subr.mxu0 %v3246_v0  ;;  %2616 = vmatprep.subr.mxu1 %v3246_v0  ;;  %v498_v6 = vld [vmem:[#allocation5 + $0x28] sm:$0xff]  ;;  %s476_s17 = scalar_lea.vmem %s4125_s0, %s2300_s27  ;;  %v497_v8 = vld [vmem:[#allocation5 + $0x20] sm:$0xff]  ;;  %v505_v10 = vld [vmem:[#allocation5 + $0x58] sm:$0xff]  ;;  %s481_s24 = scalar_lea.vmem %s4138_s13, %s2350_s19 }
  0x39   : > { %2598 = vmatpush3.msra.mxu0 %v508_v3  ;;  %2617 = vmatpush3.msra.mxu1 %v499_v4  ;;  %v486_v9 = vld [vmem:[%s476_s17] sm:$0xff]  ;;  %v504_v12 = vld [vmem:[#allocation5 + $0x50] sm:$0xff]  ;;  %v503_v14 = vld [vmem:[#allocation5 + $0x48] sm:$0xff] }
  0x3a   : > { %2599 = vmatprep.subr.mxu0 %v3246_v0  ;;  %2618 = vmatprep.subr.mxu1 %v3246_v0  ;;  %v496_v11 = vld [vmem:[#allocation5 + $0x18] sm:$0xff]  ;;  %487 = vst.msk [vmem:[#allocation2 + $0x8] sm:$0xff] %vm482_vm0, %v486_v9  ;;  %v495_v13 = vld [vmem:[#allocation5 + $0x10] sm:$0xff]  ;;  %v494_v15 = vld [vmem:[#allocation5 + $0x8] sm:$0xff] }
  0x3b   : > { %2600 = vmatpush3.msra.mxu0 %v507_v5  ;;  %2619 = vmatpush3.msra.mxu1 %v498_v6  ;;  %v502_v16 = vld [vmem:[#allocation5 + $0x40] sm:$0xff]  ;;  %v668_v24 = vld [vmem:[#allocation5 + $0xb8] sm:$0xff]  ;;  %v667_v26 = vld [vmem:[#allocation5 + $0xb0] sm:$0xff] }
  0x3c   : > { %2601 = vmatprep.subr.mxu0 %v3246_v0  ;;  %2620 = vmatprep.subr.mxu1 %v3246_v0  ;;  %v493_v17 = vld [vmem:[#allocation5] sm:$0xff]  ;;  %v666_v27 = vld [vmem:[#allocation5 + $0xa8] sm:$0xff]  ;;  %v664_v29 = vld [vmem:[#allocation5 + $0x98] sm:$0xff] }
  0x3d   : > { %2602 = vmatpush3.msra.mxu0 %v506_v7  ;;  %2621 = vmatpush3.msra.mxu1 %v497_v8  ;;  %v665_v28 = vld [vmem:[#allocation5 + $0xa0] sm:$0xff]  ;;  %v663_v30 = vld [vmem:[#allocation5 + $0x90] sm:$0xff]  ;;  %v662_v33 = vld [vmem:[#allocation5 + $0x88] sm:$0xff] }
  0x3e   : > { %2603 = vmatprep.subr.mxu0 %v3246_v0  ;;  %2622 = vmatprep.subr.mxu1 %v3246_v0  ;;  %v661_v34 = vld [vmem:[#allocation5 + $0x80] sm:$0xff]  ;;  %v762_v36 = vld [vmem:[%s4128_s3 + $0x38] sm:$0xff]  ;;  %v761_v37 = vld [vmem:[%s4128_s3 + $0x30] sm:$0xff] }
  0x3f   : > { %2604 = vmatpush3.msra.mxu0 %v505_v10  ;;  %2623 = vmatpush3.msra.mxu1 %v496_v11  ;;  %v760_v38 = vld [vmem:[%s4128_s3 + $0x28] sm:$0xff]  ;;  %v759_v39 = vld [vmem:[%s4128_s3 + $0x20] sm:$0xff]  ;;  %v758_v40 = vld [vmem:[%s4128_s3 + $0x18] sm:$0xff] }
  0x40   : > { %2605 = vmatprep.subr.mxu0 %v3246_v0  ;;  %2624 = vmatprep.subr.mxu1 %v3246_v0  ;;  %v757_v41 = vld [vmem:[%s4128_s3 + $0x10] sm:$0xff]  ;;  %v756_v42 = vld [vmem:[%s4128_s3 + $0x8] sm:$0xff]  ;;  %v755_v43 = vld [vmem:[%s4128_s3] sm:$0xff] }
  0x41   : > { %2606 = vmatpush3.msra.mxu0 %v504_v12  ;;  %2625 = vmatpush3.msra.mxu1 %v495_v13  ;;  %v489_v18 = vld [vmem:[#allocation2 + $0x7] sm:$0xff]  ;;  %v490_v19 = vld [vmem:[#allocation2 + $0xf] sm:$0x3]  ;;  %v2306_v50 = vld [vmem:[%s4127_s2] ss:$0 sm:$0xff] }
  0x42   : > { %2607 = vmatprep.subr.mxu0 %v3246_v0  ;;  %2626 = vmatprep.subr.mxu1 %v3246_v0  ;;  %v491_v20 = vmax.f32 %v489_v18, 0.0  ;;  %v492_v21 = vmax.f32 %v490_v19, 0.0  ;;  %v858_v55 = vld [vmem:[#allocation7 + $0x38] sm:$0xff]  ;;  %v857_v57 = vld [vmem:[#allocation7 + $0x30] sm:$0xff]  ;;  %v856_v59 = vld [vmem:[#allocation7 + $0x28] sm:$0xff] }
  0x43   : > { %2608 = vmatpush3.msra.mxu0 %v503_v14  ;;  %2627 = vmatpush3.msra.mxu1 %v494_v15  ;;  %v867_v56 = vld [vmem:[#allocation7 + $0x78] sm:$0xff]  ;;  %v866_v58 = vld [vmem:[#allocation7 + $0x70] sm:$0xff]  ;;  %v865_v60 = vld [vmem:[#allocation7 + $0x68] sm:$0xff] }
  0x44   : > { %2609 = vmatprep.subr.mxu0 %v3246_v0  ;;  %2628 = vmatprep.subr.mxu1 %v3246_v0  ;;  %v513_v22 = vrot.slane %v491_v20, 1  ;;  %v514_v23 = vrot.slane %v492_v21, 1  ;;  %v670_v31 = vrot.slane %v491_v20, 2  ;;  %v671_v32 = vrot.slane %v492_v21, 2  ;;  %v855_v61 = vld [vmem:[#allocation7 + $0x20] sm:$0xff]  ;;  %v854_v63 = vld [vmem:[#allocation7 + $0x18] sm:$0xff] }
  0x45   : > { %2610 = vmatpush3.msra.mxu0 %v502_v16  ;;  %2629 = vmatpush3.msra.mxu1 %v493_v17  ;;  %v864_v62 = vld [vmem:[#allocation7 + $0x60] sm:$0xff]  ;;  %v863_v1 = vld [vmem:[#allocation7 + $0x58] sm:$0xff]  ;;  %v853_v2 = vld [vmem:[#allocation7 + $0x10] sm:$0xff] }
  0x46   : > { %2633 = vmatprep.subr.mxu0 %v3246_v0  ;;  %2631 = vmatmul.mubr.msk.f32.vlgmr.msra.gmra.mxu1 %vm482_vm0, %v491_v20  ;;  %v515_v25 = vsel %vm512_vm2, %v513_v22, %v514_v23  ;;  %v672_v35 = vsel %vm669_vm3, %v670_v31, %v671_v32  ;;  %v862_v3 = vld [vmem:[#allocation7 + $0x50] sm:$0xff]  ;;  %v852_v4 = vld [vmem:[#allocation7 + $0x8] sm:$0xff]  ;;  %v851_v6 = vld [vmem:[#allocation7] sm:$0xff] }
  0x47   : > { %2652 = vmatprep.subr.mxu1 %v3246_v0  ;;  %2668 = vmatprep.mubr.msk.f32.mxu1 %vm3247_vm1, %v3246_v0  ;;  %v861_v5 = vld [vmem:[#allocation7 + $0x48] sm:$0xff]  ;;  %v860_v7 = vld [vmem:[#allocation7 + $0x40] sm:$0xff]  ;;  %v2308_v10 = vld [vmem:[%s4129_s4] ss:$0 sm:$0xff] }
  0x48   : > { %2612 = vmatmul.mubr.msk.f32.vlgmr.msra.gmra.mxu0 %vm482_vm0, %v515_v25  ;;  %2653 = vmatpush3.msra.mxu1 %v762_v36  ;;  %v488_v8 = vld [vmem:[#allocation2 + $0x8] sm:$0xff]  ;;  %v1025_v20 = vld [vmem:[#allocation7 + $0xb8] sm:$0xff]  ;;  %v1024_v22 = vld [vmem:[#allocation7 + $0xb0] sm:$0xff] }
  0x49   : > { %2634 = vmatpush3.msra.mxu0 %v668_v24  ;;  %2649 = vmatprep.mubr.msk.f32.mxu0 %vm3247_vm1, %v3246_v0  ;;  %v1023_v23 = vld [vmem:[#allocation7 + $0xa8] sm:$0xff]  ;;  %v1022_v24 = vld [vmem:[#allocation7 + $0xa0] sm:$0xff]  ;;  %v1021_v25 = vld [vmem:[#allocation7 + $0x98] sm:$0xff] }
  0x4a   : > { %2635 = vmatprep.subr.mxu0 %v3246_v0  ;;  %2654 = vmatprep.subr.mxu1 %v3246_v0  ;;  %v1118_v32 = vld [vmem:[%s4132_s7 + $0x38] sm:$0xff] }
  0x4b   : > { %2636 = vmatpush3.msra.mxu0 %v667_v26  ;;  %2655 = vmatpush3.msra.mxu1 %v761_v37  ;;  %v1020_v26 = vld [vmem:[#allocation7 + $0x90] sm:$0xff]  ;;  %v1113_v37 = vld [vmem:[%s4132_s7 + $0x10] sm:$0xff] }
  0x4c   : > { %2637 = vmatprep.subr.mxu0 %v3246_v0  ;;  %2656 = vmatprep.subr.mxu1 %v3246_v0  ;;  %v1114_v36 = vld [vmem:[%s4132_s7 + $0x18] sm:$0xff] }
  0x4d   : > { %2638 = vmatpush3.msra.mxu0 %v666_v27  ;;  %2657 = vmatpush3.msra.mxu1 %v760_v38  ;;  %v1019_v27 = vld [vmem:[#allocation7 + $0x88] sm:$0xff]  ;;  %v1112_v38 = vld [vmem:[%s4132_s7 + $0x8] sm:$0xff] }
  0x4e   : > { %2639 = vmatprep.subr.mxu0 %v3246_v0  ;;  %2658 = vmatprep.subr.mxu1 %v3246_v0 }
  0x4f   : > { %2640 = vmatpush3.msra.mxu0 %v665_v28  ;;  %2659 = vmatpush3.msra.mxu1 %v759_v39  ;;  %v1111_v39 = vld [vmem:[%s4132_s7] sm:$0xff] }
  0x50   : > { %2641 = vmatprep.subr.mxu0 %v3246_v0  ;;  %2660 = vmatprep.subr.mxu1 %v3246_v0 }
  0x51   : > { %2642 = vmatpush3.msra.mxu0 %v664_v29  ;;  %2661 = vmatpush3.msra.mxu1 %v758_v40 }
  0x52   : > { %2643 = vmatprep.subr.mxu0 %v3246_v0  ;;  %2662 = vmatprep.subr.mxu1 %v3246_v0 }
  0x53   : > { %2644 = vmatpush3.msra.mxu0 %v663_v30  ;;  %2663 = vmatpush3.msra.mxu1 %v757_v41  ;;  %v1018_v30 = vld [vmem:[#allocation7 + $0x80] sm:$0xff] }
  0x54   : > { %2645 = vmatprep.subr.mxu0 %v3246_v0  ;;  %2664 = vmatprep.subr.mxu1 %v3246_v0 }
  0x55   : > { %2646 = vmatpush3.msra.mxu0 %v662_v33  ;;  %2665 = vmatpush3.msra.mxu1 %v756_v42  ;;  %v1117_v33 = vld [vmem:[%s4132_s7 + $0x30] sm:$0xff] }
  0x56   : > { %2647 = vmatprep.subr.mxu0 %v3246_v0  ;;  %2666 = vmatprep.subr.mxu1 %v3246_v0 }
  0x57   : > { %2648 = vmatpush3.msra.mxu0 %v661_v34  ;;  %2667 = vmatpush3.msra.mxu1 %v755_v43  ;;  %v1116_v34 = vld [vmem:[%s4132_s7 + $0x28] sm:$0xff] }
  0x58   : > { %2650 = vmatmul.mubr.msk.f32.vlgmr.msra.gmra.mxu0 %vm482_vm0, %v672_v35  ;;  %2671 = vmatprep.subr.mxu0 %v3246_v0  ;;  %v1115_v35 = vld [vmem:[%s4132_s7 + $0x20] sm:$0xff] }
  0x59   : > { %2687 = vmatprep.mubr.msk.f32.mxu0 %vm3247_vm1, %v3246_v0  ;;  %2690 = vmatprep.subr.mxu1 %v3246_v0 }
  0x5a   : > { %2672 = vmatpush3.msra.mxu0 %v867_v56  ;;  %v2319_v56 = vld [vmem:[%s4134_s9 + $0xe0] sm:$0xff] }
  0x5b   : > { %2673 = vmatprep.subr.mxu0 %v3246_v0 }
  0x5c   : > { %2674 = vmatpush3.msra.mxu0 %v866_v58  ;;  %v2318_v58 = vld [vmem:[%s4134_s9 + $0xd8] sm:$0xff] }
  0x5d   : > { %2675 = vmatprep.subr.mxu0 %v3246_v0 }
  0x5e   : > { %2676 = vmatpush3.msra.mxu0 %v865_v60  ;;  %v2317_v60 = vld [vmem:[%s4134_s9 + $0xd0] sm:$0xff] }
  0x5f   : > { %2677 = vmatprep.subr.mxu0 %v3246_v0 }
  0x60   : > { %2678 = vmatpush3.msra.mxu0 %v864_v62  ;;  %v2316_v62 = vld [vmem:[%s4134_s9 + $0xc8] sm:$0xff] }
  0x61   : > { %2679 = vmatprep.subr.mxu0 %v3246_v0 }
  0x62   : > { %2680 = vmatpush3.msra.mxu0 %v863_v1  ;;  %v2315_v1 = vld [vmem:[%s4134_s9 + $0xc0] sm:$0xff] }
  0x63   : > { %2681 = vmatprep.subr.mxu0 %v3246_v0 }
  0x64   : > { %2682 = vmatpush3.msra.mxu0 %v862_v3  ;;  %v2323_v3 = vld [vmem:[%s4134_s9 + $0x40] sm:$0xff] }
  0x65   : > { %2683 = vmatprep.subr.mxu0 %v3246_v0 }
  0x66   : > { %2684 = vmatpush3.msra.mxu0 %v861_v5 }
  0x67   : > { %2685 = vmatprep.subr.mxu0 %v3246_v0 }
  0x68   : > { %2686 = vmatpush3.msra.mxu0 %v860_v7 }
  0x69   : > { %2709 = vmatprep.subr.mxu0 %v3246_v0 }
 0x106   : > { %v656_v44 = vpop.f32.mrf.mxu1 }
 0x108   : > { %v2632_v45 = vpop.f32.mrf.mxu1  ;;  %v584_v46 = vpop.f32.mrf.mxu0 }
 0x109   : > { %v657_v48 = vadd.f32 %v656_v44, %v584_v46  ;;  %v2312_v46 = vld [vmem:[%s4131_s6] ss:$0 sm:$0xff] }
 0x10a   : > { %v2613_v47 = vpop.f32.mrf.mxu0 }
 0x118   : > { %v741_v49 = vpop.f32.mrf.mxu0 }
 0x119   : > { %v745_v51 = vadd.f32 %v741_v49, %v657_v48 }
 0x11a   : > { %v2651_v52 = vpop.f32.mrf.mxu0 }
 0x11b   : > { %v753_v53 = vadd.f32 %v2306_v50, %v745_v51  ;;  %v2322_v51 = vld [vmem:[%s4134_s9 + $0xf8] sm:$0xff]  ;;  %v2321_v52 = vld [vmem:[%s4134_s9 + $0xf0] sm:$0xff] }
 0x11d   : > { %v754_v54 = vmax.f32 %v753_v53, 0.0  ;;  %v2330_v53 = vld [vmem:[%s4134_s9 + $0x78] sm:$0xff] }
 0x11f   : > { %2669 = vmatmul.mubr.msk.f32.vlgmr.msra.gmra.mxu1 %vm482_vm0, %v754_v54  ;;  %v2320_v54 = vld [vmem:[%s4134_s9 + $0xe8] sm:$0xff] }
 0x120   : > { %2706 = vmatprep.mubr.msk.f32.mxu1 %vm3247_vm1, %v3246_v0  ;;  %2691 = vmatpush3.msra.mxu1 %v858_v55  ;;  %v2329_v55 = vld [vmem:[%s4134_s9 + $0x70] sm:$0xff] }
 0x121   : > { %2692 = vmatprep.subr.mxu1 %v3246_v0 }
 0x122   : > { %2693 = vmatpush3.msra.mxu1 %v857_v57  ;;  %v2328_v57 = vld [vmem:[%s4134_s9 + $0x68] sm:$0xff] }
 0x123   : > { %2694 = vmatprep.subr.mxu1 %v3246_v0 }
 0x124   : > { %2695 = vmatpush3.msra.mxu1 %v856_v59  ;;  %v2327_v59 = vld [vmem:[%s4134_s9 + $0x60] sm:$0xff] }
 0x125   : > { %2696 = vmatprep.subr.mxu1 %v3246_v0 }
 0x126   : > { %2697 = vmatpush3.msra.mxu1 %v855_v61  ;;  %v2326_v61 = vld [vmem:[%s4134_s9 + $0x58] sm:$0xff] }
 0x127   : > { %2698 = vmatprep.subr.mxu1 %v3246_v0 }
 0x128   : > { %2699 = vmatpush3.msra.mxu1 %v854_v63  ;;  %v2325_v63 = vld [vmem:[%s4134_s9 + $0x50] sm:$0xff] }
 0x129   : > { %2700 = vmatprep.subr.mxu1 %v3246_v0 }
 0x12a   : > { %2701 = vmatpush3.msra.mxu1 %v853_v2  ;;  %v2324_v2 = vld [vmem:[%s4134_s9 + $0x48] sm:$0xff] }
 0x12b   : > { %2702 = vmatprep.subr.mxu1 %v3246_v0 }
 0x12c   : > { %2703 = vmatpush3.msra.mxu1 %v852_v4 }
 0x12d   : > { %2704 = vmatprep.subr.mxu1 %v3246_v0 }
 0x12e   : > { %2705 = vmatpush3.msra.mxu1 %v851_v6  ;;  %v2314_v6 = vld [vmem:[%s4133_s8] ss:$0 sm:$0xff] }
 0x12f   : > { %2728 = vmatprep.subr.mxu1 %v3246_v0 }
 0x1df   : > { %v832_v9 = vpop.f32.mrf.mxu1 }
 0x1e0   : > { %v836_v11 = vadd.f32 %v832_v9, %v488_v8 }
 0x1e1   : > { %v2670_v12 = vpop.f32.mrf.mxu1 }
 0x1e2   : > { %v844_v13 = vadd.f32 %v2308_v10, %v836_v11 }
 0x1e4   : > { %845 = vst.msk [vmem:[#allocation2 + $0x8] sm:$0xff] %vm482_vm0, %v844_v13  ;;  %v2341_v13 = vld [vmem:[%s4134_s9 + $0xb8] sm:$0xff] }
 0x1eb   : > { %v847_v14 = vld [vmem:[#allocation2 + $0x7] sm:$0xff]  ;;  %v848_v15 = vld [vmem:[#allocation2 + $0xf] sm:$0x3] }
 0x1ec   : > { %v849_v16 = vmax.f32 %v847_v14, 0.0  ;;  %v850_v17 = vmax.f32 %v848_v15, 0.0  ;;  %v846_v4 = vld [vmem:[#allocation2 + $0x8] sm:$0xff]  ;;  %v2340_v15 = vld [vmem:[%s4134_s9 + $0xb0] sm:$0xff] }
 0x1ee   : > { %2707 = vmatmul.mubr.msk.f32.vlgmr.msra.gmra.mxu1 %vm482_vm0, %v849_v16  ;;  %v870_v18 = vrot.slane %v849_v16, 1  ;;  %v871_v19 = vrot.slane %v850_v17, 1  ;;  %v1026_v28 = vrot.slane %v849_v16, 2  ;;  %v1027_v29 = vrot.slane %v850_v17, 2 }
 0x1ef   : > { %2744 = vmatprep.mubr.msk.f32.mxu1 %vm3247_vm1, %v3246_v0  ;;  %2729 = vmatpush3.msra.mxu1 %v1118_v32 }
 0x1f0   : > { %v872_v21 = vsel %vm512_vm2, %v870_v18, %v871_v19  ;;  %v1028_v31 = vsel %vm669_vm3, %v1026_v28, %v1027_v29  ;;  %2730 = vmatprep.subr.mxu1 %v3246_v0  ;;  %v1397_v18 = vld [vmem:[%s4134_s9 + $0x38] sm:$0xff]  ;;  %v2335_v28 = vld [vmem:[%s4134_s9 + $0x88] sm:$0xff]  ;;  %v1392_v29 = vld [vmem:[%s4134_s9 + $0x10] sm:$0xff] }
 0x1f1   : > { %2688 = vmatmul.mubr.msk.f32.vlgmr.msra.gmra.mxu0 %vm482_vm0, %v872_v21  ;;  %2731 = vmatpush3.msra.mxu1 %v1117_v33  ;;  %v1396_v21 = vld [vmem:[%s4134_s9 + $0x30] sm:$0xff] }
 0x1f2   : > { %2710 = vmatpush3.msra.mxu0 %v1025_v20  ;;  %2725 = vmatprep.mubr.msk.f32.mxu0 %vm3247_vm1, %v3246_v0  ;;  %v2339_v20 = vld [vmem:[%s4134_s9 + $0xa8] sm:$0xff] }
 0x1f3   : > { %2711 = vmatprep.subr.mxu0 %v3246_v0  ;;  %2732 = vmatprep.subr.mxu1 %v3246_v0 }
 0x1f4   : > { %2712 = vmatpush3.msra.mxu0 %v1024_v22  ;;  %2733 = vmatpush3.msra.mxu1 %v1116_v34  ;;  %v2338_v22 = vld [vmem:[%s4134_s9 + $0xa0] sm:$0xff] }
 0x1f5   : > { %2713 = vmatprep.subr.mxu0 %v3246_v0  ;;  %2734 = vmatprep.subr.mxu1 %v3246_v0  ;;  %v1390_v34 = vld [vmem:[%s4134_s9] sm:$0xff] }
 0x1f6   : > { %2714 = vmatpush3.msra.mxu0 %v1023_v23  ;;  %2735 = vmatpush3.msra.mxu1 %v1115_v35  ;;  %v1395_v23 = vld [vmem:[%s4134_s9 + $0x28] sm:$0xff]  ;;  %v3696_v35 = vld [vmem:[#allocation9 + $0xf8] sm:$0xff] }
 0x1f7   : > { %2715 = vmatprep.subr.mxu0 %v3246_v0  ;;  %2736 = vmatprep.subr.mxu1 %v3246_v0 }
 0x1f8   : > { %2716 = vmatpush3.msra.mxu0 %v1022_v24  ;;  %2737 = vmatpush3.msra.mxu1 %v1114_v36  ;;  %v2337_v24 = vld [vmem:[%s4134_s9 + $0x98] sm:$0xff] }
 0x1f9   : > { %2717 = vmatprep.subr.mxu0 %v3246_v0  ;;  %2738 = vmatprep.subr.mxu1 %v3246_v0 }
 0x1fa   : > { %2718 = vmatpush3.msra.mxu0 %v1021_v25  ;;  %2739 = vmatpush3.msra.mxu1 %v1113_v37  ;;  %v1394_v25 = vld [vmem:[%s4134_s9 + $0x20] sm:$0xff]  ;;  %v3702_v37 = vld [vmem:[#allocation9 + $0xf0] sm:$0xff] }
 0x1fb   : > { %2719 = vmatprep.subr.mxu0 %v3246_v0  ;;  %2740 = vmatprep.subr.mxu1 %v3246_v0 }
 0x1fc   : > { %2720 = vmatpush3.msra.mxu0 %v1020_v26  ;;  %2741 = vmatpush3.msra.mxu1 %v1112_v38  ;;  %v2336_v26 = vld [vmem:[%s4134_s9 + $0x90] sm:$0xff] }
 0x1fd   : > { %2721 = vmatprep.subr.mxu0 %v3246_v0  ;;  %2742 = vmatprep.subr.mxu1 %v3246_v0  ;;  %v3708_v38 = vld [vmem:[#allocation9 + $0xe8] sm:$0xff] }
 0x1fe   : > { %2722 = vmatpush3.msra.mxu0 %v1019_v27  ;;  %2743 = vmatpush3.msra.mxu1 %v1111_v39  ;;  %v1393_v27 = vld [vmem:[%s4134_s9 + $0x18] sm:$0xff]  ;;  %v3714_v39 = vld [vmem:[#allocation9 + $0xe0] sm:$0xff] }
 0x1ff   : > { %2723 = vmatprep.subr.mxu0 %v3246_v0  ;;  %2766 = vmatprep.subr.mxu1 %v3246_v0 }
 0x200   : > { %2724 = vmatpush3.msra.mxu0 %v1018_v30  ;;  %v2334_v30 = vld [vmem:[%s4134_s9 + $0x80] sm:$0xff] }
 0x201   : > { %2726 = vmatmul.mubr.msk.f32.vlgmr.msra.gmra.mxu0 %vm482_vm0, %v1028_v31  ;;  %2747 = vmatprep.subr.mxu0 %v3246_v0  ;;  %v1391_v31 = vld [vmem:[%s4134_s9 + $0x8] sm:$0xff] }
 0x202   : > { %2763 = vmatprep.mubr.msk.f32.mxu0 %vm3247_vm1, %v3246_v0  ;;  %2748 = vmatpush3.msra.mxu0 %v2330_v53  ;;  %v3771_v53 = vld [vmem:[#allocation9 + $0x88] sm:$0xff] }
 0x203   : > { %2749 = vmatprep.subr.mxu0 %v3246_v0 }
 0x204   : > { %2750 = vmatpush3.msra.mxu0 %v2329_v55  ;;  %v3779_v55 = vld [vmem:[#allocation9 + $0x80] sm:$0xff] }
 0x205   : > { %2751 = vmatprep.subr.mxu0 %v3246_v0 }
 0x206   : > { %2752 = vmatpush3.msra.mxu0 %v2328_v57  ;;  %v3786_v57 = vld [vmem:[#allocation9 + $0x1d0] sm:$0xff] }
 0x207   : > { %2753 = vmatprep.subr.mxu0 %v3246_v0 }
 0x208   : > { %2754 = vmatpush3.msra.mxu0 %v2327_v59  ;;  %v3796_v59 = vld [vmem:[#allocation9 + $0x1c0] sm:$0xff] }
 0x209   : > { %2755 = vmatprep.subr.mxu0 %v3246_v0 }
 0x20a   : > { %2756 = vmatpush3.msra.mxu0 %v2326_v61  ;;  %v3804_v61 = vld [vmem:[#allocation9 + $0x1b0] sm:$0xff] }
 0x20b   : > { %2757 = vmatprep.subr.mxu0 %v3246_v0 }
 0x20c   : > { %2758 = vmatpush3.msra.mxu0 %v2325_v63  ;;  %v3812_v63 = vld [vmem:[#allocation9 + $0x1a0] sm:$0xff] }
 0x20d   : > { %2759 = vmatprep.subr.mxu0 %v3246_v0 }
 0x20e   : > { %2760 = vmatpush3.msra.mxu0 %v2324_v2  ;;  %v3819_v2 = vld [vmem:[#allocation9 + $0x190] sm:$0xff] }
 0x20f   : > { %2761 = vmatprep.subr.mxu0 %v3246_v0 }
 0x210   : > { %2762 = vmatpush3.msra.mxu0 %v2323_v3  ;;  %v3822_v3 = vld [vmem:[#allocation9 + $0x188] sm:$0xff] }
 0x211   : > { %2785 = vmatprep.subr.mxu0 %v3246_v0 }
 0x2ae   : > { %v1013_v40 = vpop.f32.mrf.mxu1 }
 0x2b0   : > { %v2708_v41 = vpop.f32.mrf.mxu1 }
 0x2b1   : > { %v941_v42 = vpop.f32.mrf.mxu0  ;;  %v3722_v41 = vld [vmem:[#allocation9 + $0xd0] sm:$0xff] }
 0x2b2   : > { %v1014_v44 = vadd.f32 %v1013_v40, %v941_v42  ;;  %v3718_v40 = vld [vmem:[#allocation9 + $0xd8] sm:$0xff]  ;;  %v3726_v42 = vld [vmem:[#allocation9 + $0xc8] sm:$0xff] }
 0x2b3   : > { %v2689_v43 = vpop.f32.mrf.mxu0 }
 0x2b4   : > { %v3732_v43 = vld [vmem:[#allocation9 + $0xc0] sm:$0xff] }
 0x2c1   : > { %v1097_v45 = vpop.f32.mrf.mxu0 }
 0x2c2   : > { %v1101_v47 = vadd.f32 %v1097_v45, %v1014_v44  ;;  %v3736_v44 = vld [vmem:[#allocation9 + $0xb8] sm:$0xff]  ;;  %v3740_v45 = vld [vmem:[#allocation9 + $0xb0] sm:$0xff] }
 0x2c3   : > { %v2727_v48 = vpop.f32.mrf.mxu0 }
 0x2c4   : > { %v1109_v49 = vadd.f32 %v2312_v46, %v1101_v47  ;;  %v3744_v46 = vld [vmem:[#allocation9 + $0xa8] sm:$0xff]  ;;  %v3747_v47 = vld [vmem:[#allocation9 + $0x1f8] sm:$0xff]  ;;  %v3750_v48 = vld [vmem:[#allocation9 + $0xa0] sm:$0xff] }
 0x2c6   : > { %v1110_v50 = vmax.f32 %v1109_v49, 0.0  ;;  %v3756_v49 = vld [vmem:[#allocation9 + $0x98] sm:$0xff] }
 0x2c8   : > { %2745 = vmatmul.mubr.msk.f32.vlgmr.msra.gmra.mxu1 %vm482_vm0, %v1110_v50  ;;  %v3758_v50 = vld [vmem:[#allocation9 + $0x1f0] sm:$0xff] }
 0x2c9   : > { %2767 = vmatpush3.msra.mxu1 %v2322_v51  ;;  %2782 = vmatprep.mubr.msk.f32.mxu1 %vm3247_vm1, %v3246_v0  ;;  %v3763_v51 = vld [vmem:[#allocation9 + $0x90] sm:$0xff] }
 0x2ca   : > { %2768 = vmatprep.subr.mxu1 %v3246_v0 }
 0x2cb   : > { %2769 = vmatpush3.msra.mxu1 %v2321_v52  ;;  %v3766_v52 = vld [vmem:[#allocation9 + $0x1e8] sm:$0xff] }
 0x2cc   : > { %2770 = vmatprep.subr.mxu1 %v3246_v0 }
 0x2cd   : > { %2771 = vmatpush3.msra.mxu1 %v2320_v54  ;;  %v3774_v54 = vld [vmem:[#allocation9 + $0x1e0] sm:$0xff] }
 0x2ce   : > { %2772 = vmatprep.subr.mxu1 %v3246_v0 }
 0x2cf   : > { %2773 = vmatpush3.msra.mxu1 %v2319_v56  ;;  %v3782_v56 = vld [vmem:[#allocation9 + $0x1d8] sm:$0xff] }
 0x2d0   : > { %2774 = vmatprep.subr.mxu1 %v3246_v0 }
 0x2d1   : > { %2775 = vmatpush3.msra.mxu1 %v2318_v58  ;;  %v3790_v58 = vld [vmem:[#allocation9 + $0x1c8] sm:$0xff] }
 0x2d2   : > { %2776 = vmatprep.subr.mxu1 %v3246_v0 }
 0x2d3   : > { %2777 = vmatpush3.msra.mxu1 %v2317_v60  ;;  %v3800_v60 = vld [vmem:[#allocation9 + $0x1b8] sm:$0xff] }
 0x2d4   : > { %2778 = vmatprep.subr.mxu1 %v3246_v0 }
 0x2d5   : > { %2779 = vmatpush3.msra.mxu1 %v2316_v62  ;;  %v3808_v62 = vld [vmem:[#allocation9 + $0x1a8] sm:$0xff] }
 0x2d6   : > { %2780 = vmatprep.subr.mxu1 %v3246_v0 }
 0x2d7   : > { %2781 = vmatpush3.msra.mxu1 %v2315_v1  ;;  %v3816_v1 = vld [vmem:[#allocation9 + $0x198] sm:$0xff] }
 0x2d8   : > { %2804 = vmatprep.subr.mxu1 %v3246_v0 }
 0x388   : > { %v1188_v5 = vpop.f32.mrf.mxu1 }
 0x389   : > { %v1192_v7 = vadd.f32 %v1188_v5, %v846_v4  ;;  %v3826_v4 = vld [vmem:[#allocation9 + $0x180] sm:$0xff] }
 0x38a   : > { %v2746_v8 = vpop.f32.mrf.mxu1 }
 0x38b   : > { %v1200_v9 = vadd.f32 %v2314_v6, %v1192_v7  ;;  %v2333_v8 = vld [vmem:[%s4135_s10] ss:$0 sm:$0xff] }
 0x38d   : > { %1201 = vst.msk [vmem:[#allocation2 + $0x8] sm:$0xff] %vm482_vm0, %v1200_v9 }
 0x394   : > { %v1202_v10 = vld [vmem:[#allocation2 + $0x7] sm:$0xff]  ;;  %v1203_v11 = vld [vmem:[#allocation2 + $0xf] sm:$0x3] }
 0x395   : > { %v1204_v12 = vmax.f32 %v1202_v10, 0.0  ;;  %v1205_v14 = vmax.f32 %v1203_v11, 0.0 }
 0x397   : > { %2783 = vmatmul.mubr.msk.f32.vlgmr.msra.gmra.mxu1 %vm482_vm0, %v1204_v12  ;;  %v1226_v16 = vrot.slane %v1204_v12, 1  ;;  %v1227_v17 = vrot.slane %v1205_v14, 1  ;;  %v1398_v32 = vrot.slane %v1204_v12, 2  ;;  %v1399_v33 = vrot.slane %v1205_v14, 2  ;;  %v3841_v14 = vld [vmem:[#allocation9 + $0x70] sm:$0xff] }
 0x398   : > { %2805 = vmatpush3.msra.mxu1 %v2341_v13  ;;  %2820 = vmatprep.mubr.msk.f32.mxu1 %vm3247_vm1, %v3246_v0  ;;  %v3837_v13 = vld [vmem:[#allocation9 + $0x78] sm:$0xff] }
 0x399   : > { %2806 = vmatprep.subr.mxu1 %v3246_v0  ;;  %v1228_v19 = vsel %vm512_vm2, %v1226_v16, %v1227_v17  ;;  %v1400_v36 = vsel %vm669_vm3, %v1398_v32, %v1399_v33  ;;  %v3851_v16 = vld [vmem:[#allocation9 + $0x60] sm:$0xff]  ;;  %v3891_v32 = vld [vmem:[#allocation9 + $0x178] sm:$0xff] }
 0x39a   : > { %2807 = vmatpush3.msra.mxu1 %v2340_v15  ;;  %2764 = vmatmul.mubr.msk.f32.vlgmr.msra.gmra.mxu0 %vm482_vm0, %v1228_v19  ;;  %v3847_v15 = vld [vmem:[#allocation9 + $0x68] sm:$0xff]  ;;  %v3894_v33 = vld [vmem:[#allocation9 + $0x18] sm:$0xff] }
 0x39b   : > { %2786 = vmatpush3.msra.mxu0 %v1397_v18  ;;  %2808 = vmatprep.subr.mxu1 %v3246_v0  ;;  %v3854_v18 = vld [vmem:[#allocation3] sm:$0xff] }
 0x39c   : > { %2787 = vmatprep.subr.mxu0 %v3246_v0  ;;  %2809 = vmatpush3.msra.mxu1 %v2339_v20 }
 0x39d   : > { %2788 = vmatpush3.msra.mxu0 %v1396_v21  ;;  %2810 = vmatprep.subr.mxu1 %v3246_v0  ;;  %v3861_v21 = vld [vmem:[#allocation9 + $0x50] sm:$0xff] }
 0x39e   : > { %2789 = vmatprep.subr.mxu0 %v3246_v0  ;;  %2811 = vmatpush3.msra.mxu1 %v2338_v22 }
 0x39f   : > { %2790 = vmatpush3.msra.mxu0 %v1395_v23  ;;  %2812 = vmatprep.subr.mxu1 %v3246_v0  ;;  %v3865_v23 = vld [vmem:[#allocation9 + $0x48] sm:$0xff] }
 0x3a0   : > { %2791 = vmatprep.subr.mxu0 %v3246_v0  ;;  %2813 = vmatpush3.msra.mxu1 %v2337_v24 }
 0x3a1   : > { %2792 = vmatpush3.msra.mxu0 %v1394_v25  ;;  %2814 = vmatprep.subr.mxu1 %v3246_v0 }
 0x3a2   : > { %2793 = vmatprep.subr.mxu0 %v3246_v0  ;;  %2815 = vmatpush3.msra.mxu1 %v2336_v26  ;;  %v3869_v26 = vld [vmem:[#allocation9 + $0x40] sm:$0xff] }
 0x3a3   : > { %2794 = vmatpush3.msra.mxu0 %v1393_v27  ;;  %2816 = vmatprep.subr.mxu1 %v3246_v0 }
 0x3a4   : > { %2795 = vmatprep.subr.mxu0 %v3246_v0  ;;  %2817 = vmatpush3.msra.mxu1 %v2335_v28  ;;  %v3875_v28 = vld [vmem:[#allocation9 + $0x38] sm:$0xff] }
 0x3a5   : > { %2796 = vmatpush3.msra.mxu0 %v1392_v29  ;;  %2818 = vmatprep.subr.mxu1 %v3246_v0  ;;  %v3880_v29 = vld [vmem:[#allocation9 + $0x30] sm:$0xff] }
 0x3a6   : > { %2797 = vmatprep.subr.mxu0 %v3246_v0  ;;  %2819 = vmatpush3.msra.mxu1 %v2334_v30  ;;  %v3884_v30 = vld [vmem:[#allocation9 + $0x28] sm:$0xff] }
 0x3a7   : > { %2798 = vmatpush3.msra.mxu0 %v1391_v31  ;;  %2821 = vmatmul.mubr.msk.f32.vlgmr.msra.gmra.mxu1 %vm482_vm0, %v1228_v19  ;;  %v3857_v19 = vld [vmem:[#allocation9 + $0x58] sm:$0xff]  ;;  %v3888_v31 = vld [vmem:[#allocation9 + $0x20] sm:$0xff] }
 0x3a8   : > { %2799 = vmatprep.subr.mxu0 %v3246_v0  ;;  %2801 = vmatprep.mubr.msk.f32.mxu0 %vm3247_vm1, %v3246_v0 }
 0x3a9   : > { %2800 = vmatpush3.msra.mxu0 %v1390_v34  ;;  %2858 = vmatprep.subr.mxu1 %v3246_v0 }
 0x3aa   : > { %2802 = vmatmul.mubr.msk.f32.vlgmr.msra.gmra.mxu0 %vm482_vm0, %v1400_v36  ;;  %2823 = vmatprep.subr.mxu0 %v3246_v0  ;;  %v3897_v36 = vld [vmem:[#allocation9 + $0x170] sm:$0xff] }
 0x3ab   : > { %2824 = vmatpush3.msra.mxu0 %v3696_v35  ;;  %2855 = vmatprep.mubr.msk.f32.mxu0 %vm3247_vm1, %v3246_v0 }
 0x3ac   : > { %2825 = vmatprep.subr.mxu0 %v3246_v0  ;;  %2890 = vmatprep.mubr.msk.f32.mxu1 %vm3247_vm1, %v3246_v0 }
 0x3ad   : > { %2826 = vmatpush3.msra.mxu0 %v3702_v37  ;;  %2859 = vmatpush3.msra.mxu1 %v3747_v47 }
 0x3ae   : > { %2827 = vmatprep.subr.mxu0 %v3246_v0  ;;  %2860 = vmatprep.subr.mxu1 %v3246_v0 }
 0x3af   : > { %2828 = vmatpush3.msra.mxu0 %v3708_v38  ;;  %2861 = vmatpush3.msra.mxu1 %v3758_v50 }
 0x3b0   : > { %2829 = vmatprep.subr.mxu0 %v3246_v0  ;;  %2862 = vmatprep.subr.mxu1 %v3246_v0 }
 0x3b1   : > { %2830 = vmatpush3.msra.mxu0 %v3714_v39  ;;  %2863 = vmatpush3.msra.mxu1 %v3766_v52 }
 0x3b2   : > { %2831 = vmatprep.subr.mxu0 %v3246_v0  ;;  %2864 = vmatprep.subr.mxu1 %v3246_v0 }
 0x3b3   : > { %2832 = vmatpush3.msra.mxu0 %v3718_v40  ;;  %2865 = vmatpush3.msra.mxu1 %v3774_v54 }
 0x3b4   : > { %2833 = vmatprep.subr.mxu0 %v3246_v0  ;;  %2866 = vmatprep.subr.mxu1 %v3246_v0 }
 0x3b5   : > { %2834 = vmatpush3.msra.mxu0 %v3722_v41  ;;  %2867 = vmatpush3.msra.mxu1 %v3782_v56 }
 0x3b6   : > { %2835 = vmatprep.subr.mxu0 %v3246_v0  ;;  %2868 = vmatprep.subr.mxu1 %v3246_v0 }
 0x3b7   : > { %2836 = vmatpush3.msra.mxu0 %v3726_v42  ;;  %2869 = vmatpush3.msra.mxu1 %v3786_v57 }
 0x3b8   : > { %2837 = vmatprep.subr.mxu0 %v3246_v0  ;;  %2870 = vmatprep.subr.mxu1 %v3246_v0 }
 0x3b9   : > { %2838 = vmatpush3.msra.mxu0 %v3732_v43  ;;  %2871 = vmatpush3.msra.mxu1 %v3790_v58 }
 0x3ba   : > { %2839 = vmatprep.subr.mxu0 %v3246_v0  ;;  %2872 = vmatprep.subr.mxu1 %v3246_v0 }
 0x3bb   : > { %2840 = vmatpush3.msra.mxu0 %v3736_v44  ;;  %2873 = vmatpush3.msra.mxu1 %v3796_v59 }
 0x3bc   : > { %2841 = vmatprep.subr.mxu0 %v3246_v0  ;;  %2874 = vmatprep.subr.mxu1 %v3246_v0 }
 0x3bd   : > { %2842 = vmatpush3.msra.mxu0 %v3740_v45  ;;  %2875 = vmatpush3.msra.mxu1 %v3800_v60 }
 0x3be   : > { %2843 = vmatprep.subr.mxu0 %v3246_v0  ;;  %2876 = vmatprep.subr.mxu1 %v3246_v0 }
 0x3bf   : > { %2844 = vmatpush3.msra.mxu0 %v3744_v46  ;;  %2877 = vmatpush3.msra.mxu1 %v3804_v61 }
 0x3c0   : > { %2845 = vmatprep.subr.mxu0 %v3246_v0  ;;  %2878 = vmatprep.subr.mxu1 %v3246_v0 }
 0x3c1   : > { %2846 = vmatpush3.msra.mxu0 %v3750_v48  ;;  %2879 = vmatpush3.msra.mxu1 %v3808_v62 }
 0x3c2   : > { %2847 = vmatprep.subr.mxu0 %v3246_v0  ;;  %2880 = vmatprep.subr.mxu1 %v3246_v0 }
 0x3c3   : > { %2848 = vmatpush3.msra.mxu0 %v3756_v49  ;;  %2881 = vmatpush3.msra.mxu1 %v3812_v63 }
 0x3c4   : > { %2849 = vmatprep.subr.mxu0 %v3246_v0  ;;  %2882 = vmatprep.subr.mxu1 %v3246_v0 }
 0x3c5   : > { %2850 = vmatpush3.msra.mxu0 %v3763_v51  ;;  %2883 = vmatpush3.msra.mxu1 %v3816_v1 }
 0x3c6   : > { %2851 = vmatprep.subr.mxu0 %v3246_v0  ;;  %2884 = vmatprep.subr.mxu1 %v3246_v0 }
 0x3c7   : > { %2852 = vmatpush3.msra.mxu0 %v3771_v53  ;;  %2885 = vmatpush3.msra.mxu1 %v3819_v2 }
 0x3c8   : > { %2853 = vmatprep.subr.mxu0 %v3246_v0  ;;  %2886 = vmatprep.subr.mxu1 %v3246_v0 }
 0x3c9   : > { %2854 = vmatpush3.msra.mxu0 %v3779_v55  ;;  %2887 = vmatpush3.msra.mxu1 %v3822_v3 }
 0x3ca   : > { %2893 = vmatprep.subr.mxu0 %v3246_v0  ;;  %2888 = vmatprep.subr.mxu1 %v3246_v0 }
 0x3cb   : > { %2889 = vmatpush3.msra.mxu1 %v3826_v4 }
 0x3cc   : > { %2928 = vmatprep.subr.mxu1 %v3246_v0 }
 0x457   : > { %v1369_v5 = vpop.f32.mrf.mxu1 }
 0x459   : > { %v2784_v6 = vpop.f32.mrf.mxu1 }
 0x45a   : > { %v1297_v7 = vpop.f32.mrf.mxu0  ;;  %v3905_v6 = vld [vmem:[#allocation9 + $0x168] sm:$0xff] }
 0x45b   : > { %v1370_v9 = vadd.f32 %v1369_v5, %v1297_v7  ;;  %v3900_v5 = vld [vmem:[#allocation9 + $0x10] sm:$0xff]  ;;  %v3908_v7 = vld [vmem:[#allocation9 + $0x8] sm:$0xff] }
 0x45c   : > { %v2765_v10 = vpop.f32.mrf.mxu0 }
 0x45d   : > { %v1380_v11 = vadd.f32 %v2333_v8, %v1370_v9  ;;  %v3916_v9 = vld [vmem:[#allocation9] sm:$0xff]  ;;  %v3921_v10 = vld [vmem:[#allocation9 + $0x158] sm:$0xff] }
 0x45f   : > { %v3835_v12 = vmax.f32 %v1380_v11, 0.0  ;;  %v3927_v11 = vld [vmem:[#allocation9 + $0x150] sm:$0xff] }
 0x461   : > { %1551 = vst [vmem:[#allocation3 + $0x8] sm:$0xff] %v3835_v12  ;;  %2856 = vmatmul.mubr.f32.vlgmr.msra.gmra.mxu0 %v3835_v12 }
 0x462   : > { %2894 = vmatpush3.msra.mxu0 %v3837_v13  ;;  %2925 = vmatprep.mubr.msk.f32.mxu0 %vm3247_vm1, %v3246_v0 }
 0x463   : > { %2895 = vmatprep.subr.mxu0 %v3246_v0 }
 0x464   : > { %2896 = vmatpush3.msra.mxu0 %v3841_v14 }
 0x465   : > { %2897 = vmatprep.subr.mxu0 %v3246_v0 }
 0x466   : > { %2898 = vmatpush3.msra.mxu0 %v3847_v15 }
 0x467   : > { %v1539_v17 = vpop.f32.mrf.mxu1  ;;  %2899 = vmatprep.subr.mxu0 %v3854_v18 }
 0x468   : > { %2900 = vmatpush3.msra.mxu0 %v3851_v16 }
 0x469   : > { %v2822_v20 = vpop.f32.mrf.mxu1  ;;  %2901 = vmatprep.subr.mxu0 %v3854_v18 }
 0x46a   : > { %v1469_v22 = vpop.f32.mrf.mxu0  ;;  %2902 = vmatpush3.msra.mxu0 %v3857_v19  ;;  %v3939_v20 = vld [vmem:[#allocation9 + $0x140] sm:$0xff] }
 0x46b   : > { %v1540_v0 = vadd.f32 %v1539_v17, %v1469_v22  ;;  %2903 = vmatprep.subr.mxu0 %v3854_v18  ;;  %v3933_v17 = vld [vmem:[#allocation9 + $0x148] sm:$0xff]  ;;  %v3945_v22 = vld [vmem:[#allocation9 + $0x138] sm:$0xff] }
 0x46c   : > { %v2803_v24 = vpop.f32.mrf.mxu0  ;;  %2904 = vmatpush3.msra.mxu0 %v3861_v21 }
 0x46d   : > { %v1543_v25 = vadd.f32 %v2333_v8, %v1540_v0  ;;  %2905 = vmatprep.subr.mxu0 %v3854_v18  ;;  %v3913_v8 = vld [vmem:[#allocation9 + $0x160] sm:$0xff] }
 0x46e   : > { %2906 = vmatpush3.msra.mxu0 %v3865_v23 }
 0x46f   : > { %v3872_v27 = vmax.f32 %v1543_v25, 0.0  ;;  %2907 = vmatprep.subr.mxu0 %v3854_v18 }
 0x470   : > { %2908 = vmatpush3.msra.mxu0 %v3869_v26 }
 0x471   : > { %1553 = vst [vmem:[#allocation4 + $0x8] sm:$0xff] %v3872_v27  ;;  %2909 = vmatprep.subr.mxu0 %v3854_v18 }
 0x472   : > { %2910 = vmatpush3.msra.mxu0 %v3875_v28 }
 0x473   : > { %2911 = vmatprep.subr.mxu0 %v3854_v18 }
 0x474   : > { %2912 = vmatpush3.msra.mxu0 %v3880_v29 }
 0x475   : > { %2913 = vmatprep.subr.mxu0 %v3854_v18 }
 0x476   : > { %2914 = vmatpush3.msra.mxu0 %v3884_v30 }
 0x477   : > { %2915 = vmatprep.subr.mxu0 %v3854_v18 }
 0x478   : > { %v1557_v34 = vld [vmem:[#allocation4 + $0x7] sm:$0xff]  ;;  %2916 = vmatpush3.msra.mxu0 %v3888_v31 }
 0x479   : > { %2891 = vmatmul.mubr.f32.vlgmr.msra.gmra.mxu1 %v1557_v34  ;;  %2917 = vmatprep.subr.mxu0 %v3854_v18 }
 0x47a   : > { %2929 = vmatpush3.msra.mxu1 %v3891_v32  ;;  %2918 = vmatpush3.msra.mxu0 %v3894_v33 }
 0x47b   : > { %2930 = vmatprep.subr.mxu1 %v3854_v18  ;;  %2919 = vmatprep.subr.mxu0 %v3854_v18 }
 0x47c   : > { %2931 = vmatpush3.msra.mxu1 %v3897_v36  ;;  %2920 = vmatpush3.msra.mxu0 %v3900_v5 }
 0x47d   : > { %2932 = vmatprep.subr.mxu1 %v3854_v18  ;;  %2921 = vmatprep.subr.mxu0 %v3854_v18 }
 0x47e   : > { %2933 = vmatpush3.msra.mxu1 %v3905_v6  ;;  %2922 = vmatpush3.msra.mxu0 %v3908_v7 }
 0x47f   : > { %2934 = vmatprep.subr.mxu1 %v3854_v18  ;;  %2923 = vmatprep.subr.mxu0 %v3854_v18 }
 0x480   : > { %2935 = vmatpush3.msra.mxu1 %v3913_v8  ;;  %2924 = vmatpush3.msra.mxu0 %v3916_v9 }
 0x481   : > { %2936 = vmatprep.subr.mxu1 %v3854_v18  ;;  %2926 = vmatmul.mubr.f32.vlgmr.msra.gmra.mxu0 %v3872_v27 }
 0x482   : > { %2937 = vmatpush3.msra.mxu1 %v3921_v10  ;;  %2963 = vmatprep.subr.mxu0 %v3854_v18 }
 0x483   : > { %2938 = vmatprep.subr.mxu1 %v3854_v18  ;;  %2964 = vmatpush3.msra.mxu0 %v3696_v35  ;;  %v3951_v35 = vld [vmem:[#allocation9 + $0x130] sm:$0xff] }
 0x484   : > { %2939 = vmatpush3.msra.mxu1 %v3927_v11  ;;  %2965 = vmatprep.subr.mxu0 %v3854_v18 }
 0x485   : > { %2940 = vmatprep.subr.mxu1 %v3854_v18  ;;  %2966 = vmatpush3.msra.mxu0 %v3702_v37  ;;  %v3957_v37 = vld [vmem:[#allocation9 + $0x128] sm:$0xff] }
 0x486   : > { %2941 = vmatpush3.msra.mxu1 %v3933_v17  ;;  %2967 = vmatprep.subr.mxu0 %v3854_v18 }
 0x487   : > { %2942 = vmatprep.subr.mxu1 %v3854_v18  ;;  %2968 = vmatpush3.msra.mxu0 %v3708_v38  ;;  %v3963_v38 = vld [vmem:[#allocation9 + $0x120] sm:$0xff] }
 0x488   : > { %2943 = vmatpush3.msra.mxu1 %v3939_v20  ;;  %2969 = vmatprep.subr.mxu0 %v3854_v18 }
 0x489   : > { %2944 = vmatprep.subr.mxu1 %v3854_v18  ;;  %2970 = vmatpush3.msra.mxu0 %v3714_v39  ;;  %v3969_v39 = vld [vmem:[#allocation9 + $0x118] sm:$0xff] }
 0x48a   : > { %2945 = vmatpush3.msra.mxu1 %v3945_v22  ;;  %2971 = vmatprep.subr.mxu0 %v3854_v18 }
 0x48b   : > { %2946 = vmatprep.subr.mxu1 %v3854_v18  ;;  %2972 = vmatpush3.msra.mxu0 %v3718_v40  ;;  %v3976_v40 = vld [vmem:[#allocation9 + $0x110] sm:$0xff] }
 0x48c   : > { %2947 = vmatpush3.msra.mxu1 %v3951_v35  ;;  %2973 = vmatprep.subr.mxu0 %v3854_v18 }
 0x48d   : > { %2948 = vmatprep.subr.mxu1 %v3854_v18  ;;  %2974 = vmatpush3.msra.mxu0 %v3722_v41  ;;  %v3982_v41 = vld [vmem:[#allocation9 + $0x108] sm:$0xff] }
 0x48e   : > { %2949 = vmatpush3.msra.mxu1 %v3957_v37  ;;  %2975 = vmatprep.subr.mxu0 %v3854_v18 }
 0x48f   : > { %2950 = vmatprep.subr.mxu1 %v3854_v18  ;;  %2976 = vmatpush3.msra.mxu0 %v3726_v42  ;;  %v3988_v42 = vld [vmem:[#allocation9 + $0x100] sm:$0xff] }
 0x490   : > { %2951 = vmatpush3.msra.mxu1 %v3963_v38  ;;  %2960 = vmatprep.mubr.msk.f32.mxu1 %vm3247_vm1, %v3854_v18 }
 0x491   : > { %2952 = vmatprep.subr.mxu1 %v3854_v18  ;;  %2977 = vmatprep.subr.mxu0 %v3854_v18 }
 0x492   : > { %2953 = vmatpush3.msra.mxu1 %v3969_v39  ;;  %2978 = vmatpush3.msra.mxu0 %v3732_v43  ;;  %v1555_v43 = vld [vmem:[#allocation3 + $0x9] sm:$0xff] }
 0x493   : > { %2954 = vmatprep.subr.mxu1 %v3854_v18  ;;  %2979 = vmatprep.subr.mxu0 %v3854_v18 }
 0x494   : > { %2955 = vmatpush3.msra.mxu1 %v3976_v40  ;;  %2980 = vmatpush3.msra.mxu0 %v3736_v44 }
 0x495   : > { %2956 = vmatprep.subr.mxu1 %v3854_v18  ;;  %2981 = vmatprep.subr.mxu0 %v3854_v18 }
 0x496   : > { %2957 = vmatpush3.msra.mxu1 %v3982_v41  ;;  %2982 = vmatpush3.msra.mxu0 %v3740_v45 }
 0x497   : > { %2958 = vmatprep.subr.mxu1 %v3854_v18  ;;  %2983 = vmatprep.subr.mxu0 %v3854_v18 }
 0x498   : > { %2959 = vmatpush3.msra.mxu1 %v3988_v42  ;;  %2984 = vmatpush3.msra.mxu0 %v3744_v46 }
 0x499   : > { %2961 = vmatmul.mubr.f32.vlgmr.msra.gmra.mxu1 %v3835_v12  ;;  %2998 = vmatprep.subr.mxu1 %v3854_v18 }
 0x49a   : > { %2999 = vmatpush3.msra.mxu1 %v3747_v47  ;;  %2985 = vmatprep.subr.mxu0 %v3854_v18  ;;  %v2344_v47 = vld [vmem:[%s4137_s12] ss:$0 sm:$0xff] }
 0x49b   : > { %3000 = vmatprep.subr.mxu1 %v3854_v18  ;;  %2986 = vmatpush3.msra.mxu0 %v3750_v48 }
 0x49c   : > { %3001 = vmatpush3.msra.mxu1 %v3758_v50  ;;  %2987 = vmatprep.subr.mxu0 %v3854_v18 }
 0x49d   : > { %3002 = vmatprep.subr.mxu1 %v3854_v18  ;;  %2988 = vmatpush3.msra.mxu0 %v3756_v49 }
 0x49e   : > { %3003 = vmatpush3.msra.mxu1 %v3766_v52  ;;  %2989 = vmatprep.subr.mxu0 %v3854_v18 }
 0x49f   : > { %3004 = vmatprep.subr.mxu1 %v3854_v18  ;;  %2990 = vmatpush3.msra.mxu0 %v3763_v51 }
 0x4a0   : > { %3005 = vmatpush3.msra.mxu1 %v3774_v54  ;;  %2991 = vmatprep.subr.mxu0 %v3854_v18 }
 0x4a1   : > { %3006 = vmatprep.subr.mxu1 %v3854_v18  ;;  %2992 = vmatpush3.msra.mxu0 %v3771_v53 }
 0x4a2   : > { %3007 = vmatpush3.msra.mxu1 %v3782_v56  ;;  %2993 = vmatprep.subr.mxu0 %v3854_v18 }
 0x4a3   : > { %3008 = vmatprep.subr.mxu1 %v3854_v18  ;;  %2994 = vmatpush3.msra.mxu0 %v3779_v55 }
 0x4a4   : > { %3009 = vmatpush3.msra.mxu1 %v3786_v57  ;;  %2995 = vmatprep.mubr.msk.f32.mxu0 %vm3247_vm1, %v3854_v18 }
 0x4a5   : > { %3010 = vmatprep.subr.mxu1 %v3854_v18  ;;  %2996 = vmatmul.mubr.f32.vlgmr.msra.gmra.mxu0 %v3872_v27 }
 0x4a6   : > { %3011 = vmatpush3.msra.mxu1 %v3790_v58  ;;  %3033 = vmatprep.subr.mxu0 %v3854_v18 }
 0x4a7   : > { %3012 = vmatprep.subr.mxu1 %v3854_v18  ;;  %3034 = vmatpush3.msra.mxu0 %v3837_v13 }
 0x4a8   : > { %3013 = vmatpush3.msra.mxu1 %v3796_v59  ;;  %3035 = vmatprep.subr.mxu0 %v3854_v18 }
 0x4a9   : > { %3014 = vmatprep.subr.mxu1 %v3854_v18  ;;  %3036 = vmatpush3.msra.mxu0 %v3841_v14 }
 0x4aa   : > { %3015 = vmatpush3.msra.mxu1 %v3800_v60  ;;  %3037 = vmatprep.subr.mxu0 %v3854_v18 }
 0x4ab   : > { %3016 = vmatprep.subr.mxu1 %v3854_v18  ;;  %3038 = vmatpush3.msra.mxu0 %v3847_v15 }
 0x4ac   : > { %3017 = vmatpush3.msra.mxu1 %v3804_v61  ;;  %3039 = vmatprep.subr.mxu0 %v3854_v18 }
 0x4ad   : > { %3018 = vmatprep.subr.mxu1 %v3854_v18  ;;  %3040 = vmatpush3.msra.mxu0 %v3851_v16 }
 0x4ae   : > { %3019 = vmatpush3.msra.mxu1 %v3808_v62  ;;  %3041 = vmatprep.subr.mxu0 %v3854_v18 }
 0x4af   : > { %3020 = vmatprep.subr.mxu1 %v3854_v18  ;;  %3042 = vmatpush3.msra.mxu0 %v3857_v19 }
 0x4b0   : > { %3021 = vmatpush3.msra.mxu1 %v3812_v63  ;;  %3043 = vmatprep.subr.mxu0 %v3854_v18 }
 0x4b1   : > { %3022 = vmatprep.subr.mxu1 %v3854_v18  ;;  %3044 = vmatpush3.msra.mxu0 %v3861_v21 }
 0x4b2   : > { %3023 = vmatpush3.msra.mxu1 %v3816_v1  ;;  %3045 = vmatprep.subr.mxu0 %v3854_v18 }
 0x4b3   : > { %3024 = vmatprep.subr.mxu1 %v3854_v18  ;;  %3046 = vmatpush3.msra.mxu0 %v3865_v23 }
 0x4b4   : > { %3025 = vmatpush3.msra.mxu1 %v3819_v2  ;;  %3030 = vmatprep.mubr.msk.f32.mxu1 %vm3247_vm1, %v3854_v18 }
 0x4b5   : > { %3026 = vmatprep.subr.mxu1 %v3854_v18  ;;  %3047 = vmatprep.subr.mxu0 %v3854_v18 }
 0x4b6   : > { %3027 = vmatpush3.msra.mxu1 %v3822_v3  ;;  %3048 = vmatpush3.msra.mxu0 %v3869_v26 }
 0x4b7   : > { %3028 = vmatprep.subr.mxu1 %v3854_v18  ;;  %3049 = vmatprep.subr.mxu0 %v3854_v18 }
 0x4b8   : > { %3029 = vmatpush3.msra.mxu1 %v3826_v4  ;;  %3050 = vmatpush3.msra.mxu0 %v3875_v28 }
 0x4b9   : > { %3031 = vmatmul.mubr.f32.vlgmr.msra.gmra.mxu1 %v3835_v12  ;;  %3068 = vmatprep.subr.mxu1 %v3854_v18 }
 0x4ba   : > { %3069 = vmatpush3.msra.mxu1 %v3891_v32  ;;  %3051 = vmatprep.subr.mxu0 %v3854_v18 }
 0x4bb   : > { %3070 = vmatprep.subr.mxu1 %v3854_v18  ;;  %3052 = vmatpush3.msra.mxu0 %v3880_v29 }
 0x4bc   : > { %3071 = vmatpush3.msra.mxu1 %v3897_v36  ;;  %3053 = vmatprep.subr.mxu0 %v3854_v18 }
 0x4bd   : > { %3072 = vmatprep.subr.mxu1 %v3854_v18  ;;  %3054 = vmatpush3.msra.mxu0 %v3884_v30 }
 0x4be   : > { %3073 = vmatpush3.msra.mxu1 %v3905_v6  ;;  %3055 = vmatprep.subr.mxu0 %v3854_v18 }
 0x4bf   : > { %3074 = vmatprep.subr.mxu1 %v3854_v18  ;;  %3056 = vmatpush3.msra.mxu0 %v3888_v31 }
 0x4c0   : > { %3075 = vmatpush3.msra.mxu1 %v3913_v8  ;;  %3057 = vmatprep.subr.mxu0 %v3854_v18 }
 0x4c1   : > { %3076 = vmatprep.subr.mxu1 %v3854_v18  ;;  %3058 = vmatpush3.msra.mxu0 %v3894_v33 }
 0x4c2   : > { %3077 = vmatpush3.msra.mxu1 %v3921_v10  ;;  %3059 = vmatprep.subr.mxu0 %v3854_v18 }
 0x4c3   : > { %3078 = vmatprep.subr.mxu1 %v3854_v18  ;;  %3060 = vmatpush3.msra.mxu0 %v3900_v5 }
 0x4c4   : > { %3079 = vmatpush3.msra.mxu1 %v3927_v11  ;;  %3061 = vmatprep.subr.mxu0 %v3854_v18 }
 0x4c5   : > { %3080 = vmatprep.subr.mxu1 %v3854_v18  ;;  %3062 = vmatpush3.msra.mxu0 %v3908_v7 }
 0x4c6   : > { %3081 = vmatpush3.msra.mxu1 %v3933_v17  ;;  %3063 = vmatprep.subr.mxu0 %v3854_v18 }
 0x4c7   : > { %3082 = vmatprep.subr.mxu1 %v3854_v18  ;;  %3064 = vmatpush3.msra.mxu0 %v3916_v9 }
 0x4c8   : > { %3083 = vmatpush3.msra.mxu1 %v3939_v20  ;;  %3065 = vmatprep.mubr.msk.f32.mxu0 %vm3247_vm1, %v3854_v18 }
 0x4c9   : > { %3084 = vmatprep.subr.mxu1 %v3854_v18  ;;  %3066 = vmatmul.mubr.f32.vlgmr.msra.gmra.mxu0 %v1555_v43 }
 0x4ca   : > { %3085 = vmatpush3.msra.mxu1 %v3945_v22  ;;  %3100 = vmatprep.mubr.msk.f32.mxu1 %vm3247_vm1, %v3854_v18 }
 0x4cb   : > { %3086 = vmatprep.subr.mxu1 %v3854_v18 }
 0x4cc   : > { %3087 = vmatpush3.msra.mxu1 %v3951_v35 }
 0x4cd   : > { %3088 = vmatprep.subr.mxu1 %v3854_v18 }
 0x4ce   : > { %3089 = vmatpush3.msra.mxu1 %v3957_v37 }
 0x4cf   : > { %3090 = vmatprep.subr.mxu1 %v3854_v18 }
 0x4d0   : > { %3091 = vmatpush3.msra.mxu1 %v3963_v38 }
 0x4d1   : > { %3092 = vmatprep.subr.mxu1 %v3854_v18 }
 0x4d2   : > { %3093 = vmatpush3.msra.mxu1 %v3969_v39 }
 0x4d3   : > { %3094 = vmatprep.subr.mxu1 %v3854_v18 }
 0x4d4   : > { %3095 = vmatpush3.msra.mxu1 %v3976_v40 }
 0x4d5   : > { %3096 = vmatprep.subr.mxu1 %v3854_v18 }
 0x4d6   : > { %3097 = vmatpush3.msra.mxu1 %v3982_v41 }
 0x4d7   : > { %3098 = vmatprep.subr.mxu1 %v3854_v18 }
 0x4d8   : > { %3099 = vmatpush3.msra.mxu1 %v3988_v42 }
 0x4d9   : > { %3101 = vmatmul.mubr.f32.vlgmr.msra.gmra.mxu1 %v3872_v27 }
 0x521   : > { %v1658_v44 = vpop.f32.mrf.mxu0 }
 0x523   : > { %v2857_v45 = vpop.f32.mrf.mxu0 }
 0x539   : > { %v1728_v46 = vpop.f32.mrf.mxu1 }
 0x53a   : > { %v1729_v48 = vadd.f32 %v1728_v46, %v1658_v44 }
 0x53b   : > { %v2892_v49 = vpop.f32.mrf.mxu1 }
 0x53c   : > { %v1739_v50 = vadd.f32 %v2344_v47, %v1729_v48 }
 0x53e   : > { %2196 = vst [vmem:[%s481_s24] sm:$0xff] %v1739_v50 }
 0x541   : > { %v1839_v51 = vpop.f32.mrf.mxu0 }
 0x543   : > { %v2927_v52 = vpop.f32.mrf.mxu0 }
 0x559   : > { %v1909_v53 = vpop.f32.mrf.mxu1 }
 0x55a   : > { %v1910_v54 = vadd.f32 %v1909_v53, %v1839_v51 }
 0x55b   : > { %v2962_v55 = vpop.f32.mrf.mxu1 }
 0x55c   : > { %v1913_v56 = vadd.f32 %v2344_v47, %v1910_v54 }
 0x55e   : > { %2345 = vst [vmem:[%s481_s24 + $0x8] sm:$0xff] %v1913_v56 }
 0x565   : > { %v1980_v57 = vpop.f32.mrf.mxu0 }
 0x567   : > { %v2997_v58 = vpop.f32.mrf.mxu0 }
 0x579   : > { %v2050_v59 = vpop.f32.mrf.mxu1 }
 0x57a   : > { %v2051_v60 = vadd.f32 %v2050_v59, %v1980_v57 }
 0x57b   : > { %v3032_v61 = vpop.f32.mrf.mxu1 }
 0x57c   : > { %v2054_v62 = vadd.f32 %v2344_v47, %v2051_v60 }
 0x57e   : > { %2346 = vst [vmem:[%s481_s24 + $0x10] sm:$0xff] %v2054_v62 }
 0x589   : > { %v2121_v63 = vpop.f32.mrf.mxu0 }
 0x58b   : > { %v3067_v1 = vpop.f32.mrf.mxu0 }
 0x599   : > { %v2191_v2 = vpop.f32.mrf.mxu1 }
 0x59a   : > { %v2192_v3 = vadd.f32 %v2191_v2, %v2121_v63 }
 0x59b   : > { %v3102_v4 = vpop.f32.mrf.mxu1 }
 0x59c   : > { %v2195_v12 = vadd.f32 %v2344_v47, %v2192_v3 }
 0x59e   : > { %2347 = vst [vmem:[%s481_s24 + $0x18] sm:$0xff] %v2195_v12 }
 0x59f PF: > { %s25_s25 = sadd.s32 1, %s3239_s25  }
 0x5a0   : > { %p22_p2 = scmp.ge.s32.totalorder %s25_s25, 4  }
 0x5a2   :  { %24 = sbr.rel (!%p22_p2) target bundleno = 2 (0x2), region = 128 }
 0x5a7   :  { %2224 = vsyncpa [#allocation6], 1 }
 0x5a8   :  { %2226 = vsyncpa [#allocation6 + $0x1], 1 }
 0x5a9   :  { %2227 = vsyncpa [#allocation8], 1 }

</bundles_post_ra>
